<compile_context>
chip_gen: v7x
topology: tpu7x:2x2x1
jax: 0.10.0
libtpu: 0.0.40
codegen_flags: <defaults>
</compile_context>

<pallas_src>
from functools import partial

import numpy as np
import jax
import jax.numpy as jnp
from jax import lax
from jax.experimental import pallas as pl
from jax.experimental.pallas import tpu as pltpu


def lstm_clf_kernel(x_ref, wih_ref, bih_ref, whh_f_ref, whh_b_ref,
                    wclf_f_ref, wclf_b_ref, bclf_ref,
                    out_ref,
                    xg_f_scr, xg_b_scr, hf_scr, hb_scr,
                    *, seq_len, batch_pad, hidden):
    T, Bp, H = seq_len, batch_pad, hidden
    G = 4 * H

    # ---- Phase 1: hoisted input projection (both directions, one big matmul) ----
    # (T*Bp, D) @ (D, 8H) ; the (b_ih + b_hh) bias is folded in so the recurrent
    # loop carries no bias add.
    xg = (jnp.dot(x_ref[...], wih_ref[...], preferred_element_type=jnp.float32)
          + bih_ref[...])
    xg_f_scr[...] = xg[:, :G]
    xg_b_scr[...] = xg[:, G:]

    # ---- Hoist weight loads + gate-type mask out of the recurrence ----
    # (refs would otherwise be re-loaded and broadcast_in_dim re-emitted per step)
    whh_f = whh_f_ref[...]
    whh_b = whh_b_ref[...]
    lane = lax.broadcasted_iota(jnp.int32, (Bp, G), 1)
    g_is_tanh = (lane >= 2 * H) & (lane < 3 * H)      # PyTorch gate order i,f,g,o

    def cell(h, c, xg_t, whh):
        gates = xg_t + jnp.dot(h, whh, preferred_element_type=jnp.float32)
        # Full-tile nonlinearities + one select instead of four sub-lane-window
        # transcendentals per step.
        act = jnp.where(g_is_tanh, jnp.tanh(gates), 1.0 / (1.0 + jnp.exp(-gates)))
        i = act[:, 0:H]
        f = act[:, H:2 * H]
        g = act[:, 2 * H:3 * H]
        o = act[:, 3 * H:4 * H]
        c_new = f * c + i * g
        h_new = o * jnp.tanh(c_new)
        return h_new, c_new

    # ---- Phase 2: both recurrences interleaved, fully unrolled (T is small) ----
    # Independent fwd/bwd chains per iteration give the VLIW scheduler work to
    # hide MXU latency of one direction under the other's VPU/EUP ops.
    z = jnp.zeros((Bp, H), jnp.float32)
    h_f, c_f, h_b, c_b = z, z, z, z
    for t in range(T):
        tb = T - 1 - t
        h_f, c_f = cell(h_f, c_f, xg_f_scr[t * Bp:(t + 1) * Bp, :], whh_f)
        h_b, c_b = cell(h_b, c_b, xg_b_scr[tb * Bp:(tb + 1) * Bp, :], whh_b)
        hf_scr[t * Bp:(t + 1) * Bp, :] = h_f       # aligned 8-row stores
        hb_scr[tb * Bp:(tb + 1) * Bp, :] = h_b

    # ---- Phase 3: dropout (eval) == identity; fused ReLU + classifier ----
    # Two lane-dense (T*Bp, H) @ (H, Cpad) matmuls + bias, one dense store.
    out_ref[...] = (bclf_ref[...]
                    + jnp.dot(jnp.maximum(hf_scr[...], 0.0), wclf_f_ref[...],
                              preferred_element_type=jnp.float32)
                    + jnp.dot(jnp.maximum(hb_scr[...], 0.0), wclf_b_ref[...],
                              preferred_element_type=jnp.float32))


def lstm_classifier(x, params):
    """x: (B, T, D) float32 -> (B, T, n_classes) float32 (eval-mode dropout)."""
    B, T, D = x.shape
    H = params["whh_f"].shape[0]
    C = params["bclf"].shape[-1]

    Bp = ((B + 7) // 8) * 8            # fill sublanes / MXU rows
    Cp = ((C + 127) // 128) * 128      # lane-dense classifier output

    # time-major, batch-padded, flattened to 2-D for aligned kernel matmuls
    x_tbd = jnp.transpose(x, (1, 0, 2))                      # (T, B, D)
    x_tbd = jnp.pad(x_tbd, ((0, 0), (0, Bp - B), (0, 0)))    # (T, Bp, D)
    x2d = x_tbd.reshape(T * Bp, D)

    wih_cat = jnp.concatenate([params["wih_f"], params["wih_b"]], axis=1)  # (D, 8H)
    bih_cat = jnp.concatenate([params["b_f"], params["b_b"]], axis=1)      # (1, 8H)

    def pad_c(w):
        return jnp.pad(w, ((0, 0), (0, Cp - C)))
    wclf_f = pad_c(params["wclf_f"])    # (H, Cp)
    wclf_b = pad_c(params["wclf_b"])    # (H, Cp)
    bclf = pad_c(params["bclf"])        # (1, Cp)

    inputs = (x2d, wih_cat, bih_cat, params["whh_f"], params["whh_b"],
              wclf_f, wclf_b, bclf)

    in_specs = [pl.BlockSpec(a.shape, lambda *_, n=a.ndim: (0,) * n) for a in inputs]
    out_spec = pl.BlockSpec((T * Bp, Cp), lambda *_: (0, 0))

    scratch = [pltpu.VMEM((T * Bp, 4 * H), jnp.float32),   # hoisted x-proj fwd
               pltpu.VMEM((T * Bp, 4 * H), jnp.float32),   # hoisted x-proj bwd
               pltpu.VMEM((T * Bp, H), jnp.float32),       # per-step h fwd
               pltpu.VMEM((T * Bp, H), jnp.float32)]       # per-step h bwd

    # Size the VMEM request to the actual footprint (v7x has only 64 MiB / TC).
    f32 = 4
    vmem_bytes = f32 * (sum(int(np.prod(a.shape)) for a in inputs)
                        + T * Bp * Cp                       # output
                        + 2 * T * Bp * 4 * H + 2 * T * Bp * H)
    vmem_limit = int(min(max(2 * vmem_bytes + (1 << 20), 16 << 20), 48 << 20))

    kernel = partial(lstm_clf_kernel, seq_len=T, batch_pad=Bp, hidden=H)

    out2d = pl.pallas_call(
        kernel,
        out_shape=jax.ShapeDtypeStruct((T * Bp, Cp), jnp.float32),
        in_specs=in_specs,
        out_specs=out_spec,
        scratch_shapes=scratch,
        compiler_params=pltpu.CompilerParams(vmem_limit_bytes=vmem_limit),
    )(*inputs)

    # TODO(synk): for production sizes (large B / T) add a batch-tile grid with
    # dimension_semantics=("parallel",) (and split directions across TCs on v7x)
    # instead of loading the whole sequence as one block.
    out = out2d.reshape(T, Bp, Cp)[:, :B, :C]
    return jnp.transpose(out, (1, 0, 2))   # back to (B, T, C)


def init_params(key, input_dim, hidden_dim, n_classes):
    """Deterministic init matching the PyTorch module's parameter shapes."""
    ks = jax.random.split(key, 11)
    k_lstm = 1.0 / np.sqrt(hidden_dim)
    k_lin = 1.0 / np.sqrt(2 * hidden_dim)

    def u(k, shape, scale):
        return jax.random.uniform(k, shape, jnp.float32, -scale, scale)

    # PyTorch shapes: w_ih (4H, D), w_hh (4H, H), b_ih/b_hh (4H,), gate order i,f,g,o
    w_ih_f = u(ks[0], (4 * hidden_dim, input_dim), k_lstm)
    w_hh_f = u(ks[1], (4 * hidden_dim, hidden_dim), k_lstm)
    b_ih_f = u(ks[2], (4 * hidden_dim,), k_lstm)
    b_hh_f = u(ks[3], (4 * hidden_dim,), k_lstm)
    w_ih_b = u(ks[4], (4 * hidden_dim, input_dim), k_lstm)
    w_hh_b = u(ks[5], (4 * hidden_dim, hidden_dim), k_lstm)
    b_ih_b = u(ks[6], (4 * hidden_dim,), k_lstm)
    b_hh_b = u(ks[7], (4 * hidden_dim,), k_lstm)
    w_clf = u(ks[8], (n_classes, 2 * hidden_dim), k_lin)
    b_clf = u(ks[9], (n_classes,), k_lin)

    w_clf_t = w_clf.T  # (2H, C)
    return {
        "wih_f": w_ih_f.T,                       # (D, 4H)
        "whh_f": w_hh_f.T,                       # (H, 4H)
        "b_f": (b_ih_f + b_hh_f)[None, :],       # (1, 4H)
        "wih_b": w_ih_b.T,
        "whh_b": w_hh_b.T,
        "b_b": (b_ih_b + b_hh_b)[None, :],
        "wclf_f": w_clf_t[:hidden_dim, :],       # (H, C)
        "wclf_b": w_clf_t[hidden_dim:, :],       # (H, C)
        "bclf": b_clf[None, :],                  # (1, C)
    }


def reference(x, params):
    """Pure-JAX reference (PyTorch bidirectional LSTM + ReLU + Linear, eval mode)."""
    B, T, D = x.shape
    H = params["whh_f"].shape[0]
    x_t = jnp.transpose(x, (1, 0, 2))  # (T, B, D)

    def run_dir(xs, wih, whh, b):
        def step(carry, xt):
            h, c = carry
            gates = xt @ wih + h @ whh + b
            i, f, g, o = jnp.split(gates, 4, axis=-1)
            i, f, o = jax.nn.sigmoid(i), jax.nn.sigmoid(f), jax.nn.sigmoid(o)
            g = jnp.tanh(g)
            c = f * c + i * g
            h = o * jnp.tanh(c)
            return (h, c), h
        init = (jnp.zeros((B, H), jnp.float32), jnp.zeros((B, H), jnp.float32))
        _, hs = lax.scan(step, init, xs)
        return hs  # (T, B, H)

    h_f = run_dir(x_t, params["wih_f"], params["whh_f"], params["b_f"])
    h_b = run_dir(x_t[::-1], params["wih_b"], params["whh_b"], params["b_b"])[::-1]
    out = (jnp.maximum(h_f, 0.0) @ params["wclf_f"]
           + jnp.maximum(h_b, 0.0) @ params["wclf_b"]
           + params["bclf"])
    return jnp.transpose(out, (1, 0, 2))


if __name__ == "__main__":
    # Small shapes consistent with the module's forward: (B, T, input_dim)
    B, T, D, H, C = 2, 8, 32, 32, 5

    key = jax.random.PRNGKey(0)
    k_x, k_p = jax.random.split(key)
    x = jax.random.normal(k_x, (B, T, D), jnp.float32)
    params = init_params(k_p, D, H, C)

    out = lstm_classifier(x, params)
    out = jax.block_until_ready(out)

    ref = reference(x, params)
    np.testing.assert_allclose(np.asarray(out), np.asarray(ref), rtol=1e-5, atol=1e-5)

    # TODO(synk): dropout is modeled as eval-mode identity; training-mode stochastic
    # dropout would use pltpu.prng_seed / pltpu.stateful_bernoulli inside the kernel.
    print("KERNEL_OK")
</pallas_src>

<mosaic_0001>
module attributes {stable_mosaic.version = 11 : i64} {
  func.func @lstm_clf_kernel(%arg0: memref<64x32xf32, #tpu.memory_space<vmem>>, %arg1: memref<32x256xf32, #tpu.memory_space<vmem>>, %arg2: memref<1x256xf32, #tpu.memory_space<vmem>>, %arg3: memref<32x128xf32, #tpu.memory_space<vmem>>, %arg4: memref<32x128xf32, #tpu.memory_space<vmem>>, %arg5: memref<32x128xf32, #tpu.memory_space<vmem>>, %arg6: memref<32x128xf32, #tpu.memory_space<vmem>>, %arg7: memref<1x128xf32, #tpu.memory_space<vmem>>, %arg8: memref<64x128xf32, #tpu.memory_space<vmem>>, %arg9: memref<64x128xf32, #tpu.memory_space<vmem>>, %arg10: memref<64x128xf32, #tpu.memory_space<vmem>>, %arg11: memref<64x32xf32, #tpu.memory_space<vmem>>, %arg12: memref<64x32xf32, #tpu.memory_space<vmem>>) attributes {dimension_semantics = [], scalar_prefetch = 0 : i64, scratch_operands = 4 : i64, tpu.core_type = #tpu.core_type<tc>} {
    %c0 = arith.constant 0 : index
    %c0_0 = arith.constant 0 : index
    %0 = vector.load %arg0[%c0, %c0_0] : memref<64x32xf32, #tpu.memory_space<vmem>>, vector<64x32xf32>
    %c0_1 = arith.constant 0 : index
    %c0_2 = arith.constant 0 : index
    %1 = vector.load %arg1[%c0_1, %c0_2] : memref<32x256xf32, #tpu.memory_space<vmem>>, vector<32x256xf32>
    %cst = arith.constant dense<0.000000e+00> : vector<64x256xf32>
    %2 = tpu.matmul %0, %1, %cst {dimension_numbers = #tpu.dot_dimension_numbers<[1], [0], [0], [1], [0, 0, 1, 1], [], []>} : vector<64x32xf32>, vector<32x256xf32>, vector<64x256xf32> -> vector<64x256xf32>
    %c0_3 = arith.constant 0 : index
    %c0_4 = arith.constant 0 : index
    %3 = vector.load %arg2[%c0_3, %c0_4] : memref<1x256xf32, #tpu.memory_space<vmem>>, vector<1x256xf32>
    %4 = vector.broadcast %3 : vector<1x256xf32> to vector<64x256xf32>
    %5 = arith.addf %2, %4 : vector<64x256xf32>
    %6 = vector.extract_strided_slice %5 {offsets = [0, 0], sizes = [64, 128], strides = [1, 1]} : vector<64x256xf32> to vector<64x128xf32>
    %c0_5 = arith.constant 0 : index
    %c0_6 = arith.constant 0 : index
    %7 = vector.load %arg9[%c0_5, %c0_6] : memref<64x128xf32, #tpu.memory_space<vmem>>, vector<64x128xf32>
    tpu.vector_store %arg9[%c0_5, %c0_6], %6 {strides = array<i32>} : memref<64x128xf32, #tpu.memory_space<vmem>>, vector<64x128xf32>,
    %8 = vector.extract_strided_slice %5 {offsets = [0, 128], sizes = [64, 128], strides = [1, 1]} : vector<64x256xf32> to vector<64x128xf32>
    %c0_7 = arith.constant 0 : index
    %c0_8 = arith.constant 0 : index
    %9 = vector.load %arg10[%c0_7, %c0_8] : memref<64x128xf32, #tpu.memory_space<vmem>>, vector<64x128xf32>
    tpu.vector_store %arg10[%c0_7, %c0_8], %8 {strides = array<i32>} : memref<64x128xf32, #tpu.memory_space<vmem>>, vector<64x128xf32>,
    %c0_9 = arith.constant 0 : index
    %c0_10 = arith.constant 0 : index
    %10 = vector.load %arg3[%c0_9, %c0_10] : memref<32x128xf32, #tpu.memory_space<vmem>>, vector<32x128xf32>
    %c0_11 = arith.constant 0 : index
    %c0_12 = arith.constant 0 : index
    %11 = vector.load %arg4[%c0_11, %c0_12] : memref<32x128xf32, #tpu.memory_space<vmem>>, vector<32x128xf32>
    %12 = tpu.iota {dimensions = array<i32: 1>} : vector<8x128xi32>
    %c64_i32 = arith.constant 64 : i32
    %13 = vector.broadcast %c64_i32 : i32 to vector<8x128xi32>
    %14 = arith.cmpi sge, %12, %13 : vector<8x128xi32>
    %c96_i32 = arith.constant 96 : i32
    %15 = vector.broadcast %c96_i32 : i32 to vector<8x128xi32>
    %16 = arith.cmpi slt, %12, %15 : vector<8x128xi32>
    %17 = arith.andi %14, %16 : vector<8x128xi1>
    %cst_13 = arith.constant 0.000000e+00 : f32
    %18 = vector.broadcast %cst_13 : f32 to vector<8x32xf32>
    %c0_14 = arith.constant 0 : index
    %c0_15 = arith.constant 0 : index
    %19 = vector.load %arg9[%c0_14, %c0_15] : memref<64x128xf32, #tpu.memory_space<vmem>>, vector<8x128xf32>
    %cst_16 = arith.constant dense<0.000000e+00> : vector<8x128xf32>
    %20 = tpu.matmul %18, %10, %cst_16 {dimension_numbers = #tpu.dot_dimension_numbers<[1], [0], [0], [1], [0, 0, 1, 1], [], []>} : vector<8x32xf32>, vector<32x128xf32>, vector<8x128xf32> -> vector<8x128xf32>
    %21 = arith.addf %19, %20 : vector<8x128xf32>
    %22 = math.tanh %21 : vector<8x128xf32>
    %cst_17 = arith.constant 0.000000e+00 : f32
    %23 = vector.broadcast %cst_17 : f32 to vector<8x128xf32>
    %24 = arith.subf %23, %21 : vector<8x128xf32>
    %25 = math.exp %24 : vector<8x128xf32>
    %cst_18 = arith.constant 1.000000e+00 : f32
    %26 = vector.broadcast %cst_18 : f32 to vector<8x128xf32>
    %27 = arith.addf %26, %25 : vector<8x128xf32>
    %cst_19 = arith.constant 1.000000e+00 : f32
    %28 = vector.broadcast %cst_19 : f32 to vector<8x128xf32>
    %29 = arith.divf %28, %27 : vector<8x128xf32>
    %30 = arith.select %17, %22, %29 : vector<8x128xi1>, vector<8x128xf32>
    %31 = vector.extract_strided_slice %30 {offsets = [0, 0], sizes = [8, 32], strides = [1, 1]} : vector<8x128xf32> to vector<8x32xf32>
    %32 = vector.extract_strided_slice %30 {offsets = [0, 32], sizes = [8, 32], strides = [1, 1]} : vector<8x128xf32> to vector<8x32xf32>
    %33 = vector.extract_strided_slice %30 {offsets = [0, 64], sizes = [8, 32], strides = [1, 1]} : vector<8x128xf32> to vector<8x32xf32>
    %34 = vector.extract_strided_slice %30 {offsets = [0, 96], sizes = [8, 32], strides = [1, 1]} : vector<8x128xf32> to vector<8x32xf32>
    %35 = arith.mulf %32, %18 : vector<8x32xf32>
    %36 = arith.mulf %31, %33 : vector<8x32xf32>
    %37 = arith.addf %35, %36 : vector<8x32xf32>
    %38 = math.tanh %37 : vector<8x32xf32>
    %39 = arith.mulf %34, %38 : vector<8x32xf32>
    %c56 = arith.constant 56 : index
    %c0_20 = arith.constant 0 : index
    %40 = vector.load %arg10[%c56, %c0_20] : memref<64x128xf32, #tpu.memory_space<vmem>>, vector<8x128xf32>
    %cst_21 = arith.constant dense<0.000000e+00> : vector<8x128xf32>
    %41 = tpu.matmul %18, %11, %cst_21 {dimension_numbers = #tpu.dot_dimension_numbers<[1], [0], [0], [1], [0, 0, 1, 1], [], []>} : vector<8x32xf32>, vector<32x128xf32>, vector<8x128xf32> -> vector<8x128xf32>
    %42 = arith.addf %40, %41 : vector<8x128xf32>
    %43 = math.tanh %42 : vector<8x128xf32>
    %cst_22 = arith.constant 0.000000e+00 : f32
    %44 = vector.broadcast %cst_22 : f32 to vector<8x128xf32>
    %45 = arith.subf %44, %42 : vector<8x128xf32>
    %46 = math.exp %45 : vector<8x128xf32>
    %cst_23 = arith.constant 1.000000e+00 : f32
    %47 = vector.broadcast %cst_23 : f32 to vector<8x128xf32>
    %48 = arith.addf %47, %46 : vector<8x128xf32>
    %cst_24 = arith.constant 1.000000e+00 : f32
    %49 = vector.broadcast %cst_24 : f32 to vector<8x128xf32>
    %50 = arith.divf %49, %48 : vector<8x128xf32>
    %51 = arith.select %17, %43, %50 : vector<8x128xi1>, vector<8x128xf32>
    %52 = vector.extract_strided_slice %51 {offsets = [0, 0], sizes = [8, 32], strides = [1, 1]} : vector<8x128xf32> to vector<8x32xf32>
    %53 = vector.extract_strided_slice %51 {offsets = [0, 32], sizes = [8, 32], strides = [1, 1]} : vector<8x128xf32> to vector<8x32xf32>
    %54 = vector.extract_strided_slice %51 {offsets = [0, 64], sizes = [8, 32], strides = [1, 1]} : vector<8x128xf32> to vector<8x32xf32>
    %55 = vector.extract_strided_slice %51 {offsets = [0, 96], sizes = [8, 32], strides = [1, 1]} : vector<8x128xf32> to vector<8x32xf32>
    %56 = arith.mulf %53, %18 : vector<8x32xf32>
    %57 = arith.mulf %52, %54 : vector<8x32xf32>
    %58 = arith.addf %56, %57 : vector<8x32xf32>
    %59 = math.tanh %58 : vector<8x32xf32>
    %60 = arith.mulf %55, %59 : vector<8x32xf32>
    %c0_25 = arith.constant 0 : index
    %c0_26 = arith.constant 0 : index
    %61 = vector.load %arg11[%c0_25, %c0_26] : memref<64x32xf32, #tpu.memory_space<vmem>>, vector<8x32xf32>
    tpu.vector_store %arg11[%c0_25, %c0_26], %39 {strides = array<i32>} : memref<64x32xf32, #tpu.memory_space<vmem>>, vector<8x32xf32>,
    %c56_27 = arith.constant 56 : index
    %c0_28 = arith.constant 0 : index
    %62 = vector.load %arg12[%c56_27, %c0_28] : memref<64x32xf32, #tpu.memory_space<vmem>>, vector<8x32xf32>
    tpu.vector_store %arg12[%c56_27, %c0_28], %60 {strides = array<i32>} : memref<64x32xf32, #tpu.memory_space<vmem>>, vector<8x32xf32>,
    %c8 = arith.constant 8 : index
    %c0_29 = arith.constant 0 : index
    %63 = vector.load %arg9[%c8, %c0_29] : memref<64x128xf32, #tpu.memory_space<vmem>>, vector<8x128xf32>
    %cst_30 = arith.constant dense<0.000000e+00> : vector<8x128xf32>
    %64 = tpu.matmul %39, %10, %cst_30 {dimension_numbers = #tpu.dot_dimension_numbers<[1], [0], [0], [1], [0, 0, 1, 1], [], []>} : vector<8x32xf32>, vector<32x128xf32>, vector<8x128xf32> -> vector<8x128xf32>
    %65 = arith.addf %63, %64 : vector<8x128xf32>
    %66 = math.tanh %65 : vector<8x128xf32>
    %cst_31 = arith.constant 0.000000e+00 : f32
    %67 = vector.broadcast %cst_31 : f32 to vector<8x128xf32>
    %68 = arith.subf %67, %65 : vector<8x128xf32>
    %69 = math.exp %68 : vector<8x128xf32>
    %cst_32 = arith.constant 1.000000e+00 : f32
    %70 = vector.broadcast %cst_32 : f32 to vector<8x128xf32>
    %71 = arith.addf %70, %69 : vector<8x128xf32>
    %cst_33 = arith.constant 1.000000e+00 : f32
    %72 = vector.broadcast %cst_33 : f32 to vector<8x128xf32>
    %73 = arith.divf %72, %71 : vector<8x128xf32>
    %74 = arith.select %17, %66, %73 : vector<8x128xi1>, vector<8x128xf32>
    %75 = vector.extract_strided_slice %74 {offsets = [0, 0], sizes = [8, 32], strides = [1, 1]} : vector<8x128xf32> to vector<8x32xf32>
    %76 = vector.extract_strided_slice %74 {offsets = [0, 32], sizes = [8, 32], strides = [1, 1]} : vector<8x128xf32> to vector<8x32xf32>
    %77 = vector.extract_strided_slice %74 {offsets = [0, 64], sizes = [8, 32], strides = [1, 1]} : vector<8x128xf32> to vector<8x32xf32>
    %78 = vector.extract_strided_slice %74 {offsets = [0, 96], sizes = [8, 32], strides = [1, 1]} : vector<8x128xf32> to vector<8x32xf32>
    %79 = arith.mulf %76, %37 : vector<8x32xf32>
    %80 = arith.mulf %75, %77 : vector<8x32xf32>
    %81 = arith.addf %79, %80 : vector<8x32xf32>
    %82 = math.tanh %81 : vector<8x32xf32>
    %83 = arith.mulf %78, %82 : vector<8x32xf32>
    %c48 = arith.constant 48 : index
    %c0_34 = arith.constant 0 : index
    %84 = vector.load %arg10[%c48, %c0_34] : memref<64x128xf32, #tpu.memory_space<vmem>>, vector<8x128xf32>
    %cst_35 = arith.constant dense<0.000000e+00> : vector<8x128xf32>
    %85 = tpu.matmul %60, %11, %cst_35 {dimension_numbers = #tpu.dot_dimension_numbers<[1], [0], [0], [1], [0, 0, 1, 1], [], []>} : vector<8x32xf32>, vector<32x128xf32>, vector<8x128xf32> -> vector<8x128xf32>
    %86 = arith.addf %84, %85 : vector<8x128xf32>
    %87 = math.tanh %86 : vector<8x128xf32>
    %cst_36 = arith.constant 0.000000e+00 : f32
    %88 = vector.broadcast %cst_36 : f32 to vector<8x128xf32>
    %89 = arith.subf %88, %86 : vector<8x128xf32>
    %90 = math.exp %89 : vector<8x128xf32>
    %cst_37 = arith.constant 1.000000e+00 : f32
    %91 = vector.broadcast %cst_37 : f32 to vector<8x128xf32>
    %92 = arith.addf %91, %90 : vector<8x128xf32>
    %cst_38 = arith.constant 1.000000e+00 : f32
    %93 = vector.broadcast %cst_38 : f32 to vector<8x128xf32>
    %94 = arith.divf %93, %92 : vector<8x128xf32>
    %95 = arith.select %17, %87, %94 : vector<8x128xi1>, vector<8x128xf32>
    %96 = vector.extract_strided_slice %95 {offsets = [0, 0], sizes = [8, 32], strides = [1, 1]} : vector<8x128xf32> to vector<8x32xf32>
    %97 = vector.extract_strided_slice %95 {offsets = [0, 32], sizes = [8, 32], strides = [1, 1]} : vector<8x128xf32> to vector<8x32xf32>
    %98 = vector.extract_strided_slice %95 {offsets = [0, 64], sizes = [8, 32], strides = [1, 1]} : vector<8x128xf32> to vector<8x32xf32>
    %99 = vector.extract_strided_slice %95 {offsets = [0, 96], sizes = [8, 32], strides = [1, 1]} : vector<8x128xf32> to vector<8x32xf32>
    %100 = arith.mulf %97, %58 : vector<8x32xf32>
    %101 = arith.mulf %96, %98 : vector<8x32xf32>
    %102 = arith.addf %100, %101 : vector<8x32xf32>
    %103 = math.tanh %102 : vector<8x32xf32>
    %104 = arith.mulf %99, %103 : vector<8x32xf32>
    %c8_39 = arith.constant 8 : index
    %c0_40 = arith.constant 0 : index
    %105 = vector.load %arg11[%c8_39, %c0_40] : memref<64x32xf32, #tpu.memory_space<vmem>>, vector<8x32xf32>
    tpu.vector_store %arg11[%c8_39, %c0_40], %83 {strides = array<i32>} : memref<64x32xf32, #tpu.memory_space<vmem>>, vector<8x32xf32>,
    %c48_41 = arith.constant 48 : index
    %c0_42 = arith.constant 0 : index
    %106 = vector.load %arg12[%c48_41, %c0_42] : memref<64x32xf32, #tpu.memory_space<vmem>>, vector<8x32xf32>
    tpu.vector_store %arg12[%c48_41, %c0_42], %104 {strides = array<i32>} : memref<64x32xf32, #tpu.memory_space<vmem>>, vector<8x32xf32>,
    %c16 = arith.constant 16 : index
    %c0_43 = arith.constant 0 : index
    %107 = vector.load %arg9[%c16, %c0_43] : memref<64x128xf32, #tpu.memory_space<vmem>>, vector<8x128xf32>
    %cst_44 = arith.constant dense<0.000000e+00> : vector<8x128xf32>
    %108 = tpu.matmul %83, %10, %cst_44 {dimension_numbers = #tpu.dot_dimension_numbers<[1], [0], [0], [1], [0, 0, 1, 1], [], []>} : vector<8x32xf32>, vector<32x128xf32>, vector<8x128xf32> -> vector<8x128xf32>
    %109 = arith.addf %107, %108 : vector<8x128xf32>
    %110 = math.tanh %109 : vector<8x128xf32>
    %cst_45 = arith.constant 0.000000e+00 : f32
    %111 = vector.broadcast %cst_45 : f32 to vector<8x128xf32>
    %112 = arith.subf %111, %109 : vector<8x128xf32>
    %113 = math.exp %112 : vector<8x128xf32>
    %cst_46 = arith.constant 1.000000e+00 : f32
    %114 = vector.broadcast %cst_46 : f32 to vector<8x128xf32>
    %115 = arith.addf %114, %113 : vector<8x128xf32>
    %cst_47 = arith.constant 1.000000e+00 : f32
    %116 = vector.broadcast %cst_47 : f32 to vector<8x128xf32>
    %117 = arith.divf %116, %115 : vector<8x128xf32>
    %118 = arith.select %17, %110, %117 : vector<8x128xi1>, vector<8x128xf32>
    %119 = vector.extract_strided_slice %118 {offsets = [0, 0], sizes = [8, 32], strides = [1, 1]} : vector<8x128xf32> to vector<8x32xf32>
    %120 = vector.extract_strided_slice %118 {offsets = [0, 32], sizes = [8, 32], strides = [1, 1]} : vector<8x128xf32> to vector<8x32xf32>
    %121 = vector.extract_strided_slice %118 {offsets = [0, 64], sizes = [8, 32], strides = [1, 1]} : vector<8x128xf32> to vector<8x32xf32>
    %122 = vector.extract_strided_slice %118 {offsets = [0, 96], sizes = [8, 32], strides = [1, 1]} : vector<8x128xf32> to vector<8x32xf32>
    %123 = arith.mulf %120, %81 : vector<8x32xf32>
    %124 = arith.mulf %119, %121 : vector<8x32xf32>
    %125 = arith.addf %123, %124 : vector<8x32xf32>
    %126 = math.tanh %125 : vector<8x32xf32>
    %127 = arith.mulf %122, %126 : vector<8x32xf32>
    %c40 = arith.constant 40 : index
    %c0_48 = arith.constant 0 : index
    %128 = vector.load %arg10[%c40, %c0_48] : memref<64x128xf32, #tpu.memory_space<vmem>>, vector<8x128xf32>
    %cst_49 = arith.constant dense<0.000000e+00> : vector<8x128xf32>
    %129 = tpu.matmul %104, %11, %cst_49 {dimension_numbers = #tpu.dot_dimension_numbers<[1], [0], [0], [1], [0, 0, 1, 1], [], []>} : vector<8x32xf32>, vector<32x128xf32>, vector<8x128xf32> -> vector<8x128xf32>
    %130 = arith.addf %128, %129 : vector<8x128xf32>
    %131 = math.tanh %130 : vector<8x128xf32>
    %cst_50 = arith.constant 0.000000e+00 : f32
    %132 = vector.broadcast %cst_50 : f32 to vector<8x128xf32>
    %133 = arith.subf %132, %130 : vector<8x128xf32>
    %134 = math.exp %133 : vector<8x128xf32>
    %cst_51 = arith.constant 1.000000e+00 : f32
    %135 = vector.broadcast %cst_51 : f32 to vector<8x128xf32>
    %136 = arith.addf %135, %134 : vector<8x128xf32>
    %cst_52 = arith.constant 1.000000e+00 : f32
    %137 = vector.broadcast %cst_52 : f32 to vector<8x128xf32>
    %138 = arith.divf %137, %136 : vector<8x128xf32>
    %139 = arith.select %17, %131, %138 : vector<8x128xi1>, vector<8x128xf32>
    %140 = vector.extract_strided_slice %139 {offsets = [0, 0], sizes = [8, 32], strides = [1, 1]} : vector<8x128xf32> to vector<8x32xf32>
    %141 = vector.extract_strided_slice %139 {offsets = [0, 32], sizes = [8, 32], strides = [1, 1]} : vector<8x128xf32> to vector<8x32xf32>
    %142 = vector.extract_strided_slice %139 {offsets = [0, 64], sizes = [8, 32], strides = [1, 1]} : vector<8x128xf32> to vector<8x32xf32>
    %143 = vector.extract_strided_slice %139 {offsets = [0, 96], sizes = [8, 32], strides = [1, 1]} : vector<8x128xf32> to vector<8x32xf32>
    %144 = arith.mulf %141, %102 : vector<8x32xf32>
    %145 = arith.mulf %140, %142 : vector<8x32xf32>
    %146 = arith.addf %144, %145 : vector<8x32xf32>
    %147 = math.tanh %146 : vector<8x32xf32>
    %148 = arith.mulf %143, %147 : vector<8x32xf32>
    %c16_53 = arith.constant 16 : index
    %c0_54 = arith.constant 0 : index
    %149 = vector.load %arg11[%c16_53, %c0_54] : memref<64x32xf32, #tpu.memory_space<vmem>>, vector<8x32xf32>
    tpu.vector_store %arg11[%c16_53, %c0_54], %127 {strides = array<i32>} : memref<64x32xf32, #tpu.memory_space<vmem>>, vector<8x32xf32>,
    %c40_55 = arith.constant 40 : index
    %c0_56 = arith.constant 0 : index
    %150 = vector.load %arg12[%c40_55, %c0_56] : memref<64x32xf32, #tpu.memory_space<vmem>>, vector<8x32xf32>
    tpu.vector_store %arg12[%c40_55, %c0_56], %148 {strides = array<i32>} : memref<64x32xf32, #tpu.memory_space<vmem>>, vector<8x32xf32>,
    %c24 = arith.constant 24 : index
    %c0_57 = arith.constant 0 : index
    %151 = vector.load %arg9[%c24, %c0_57] : memref<64x128xf32, #tpu.memory_space<vmem>>, vector<8x128xf32>
    %cst_58 = arith.constant dense<0.000000e+00> : vector<8x128xf32>
    %152 = tpu.matmul %127, %10, %cst_58 {dimension_numbers = #tpu.dot_dimension_numbers<[1], [0], [0], [1], [0, 0, 1, 1], [], []>} : vector<8x32xf32>, vector<32x128xf32>, vector<8x128xf32> -> vector<8x128xf32>
    %153 = arith.addf %151, %152 : vector<8x128xf32>
    %154 = math.tanh %153 : vector<8x128xf32>
    %cst_59 = arith.constant 0.000000e+00 : f32
    %155 = vector.broadcast %cst_59 : f32 to vector<8x128xf32>
    %156 = arith.subf %155, %153 : vector<8x128xf32>
    %157 = math.exp %156 : vector<8x128xf32>
    %cst_60 = arith.constant 1.000000e+00 : f32
    %158 = vector.broadcast %cst_60 : f32 to vector<8x128xf32>
    %159 = arith.addf %158, %157 : vector<8x128xf32>
    %cst_61 = arith.constant 1.000000e+00 : f32
    %160 = vector.broadcast %cst_61 : f32 to vector<8x128xf32>
    %161 = arith.divf %160, %159 : vector<8x128xf32>
    %162 = arith.select %17, %154, %161 : vector<8x128xi1>, vector<8x128xf32>
    %163 = vector.extract_strided_slice %162 {offsets = [0, 0], sizes = [8, 32], strides = [1, 1]} : vector<8x128xf32> to vector<8x32xf32>
    %164 = vector.extract_strided_slice %162 {offsets = [0, 32], sizes = [8, 32], strides = [1, 1]} : vector<8x128xf32> to vector<8x32xf32>
    %165 = vector.extract_strided_slice %162 {offsets = [0, 64], sizes = [8, 32], strides = [1, 1]} : vector<8x128xf32> to vector<8x32xf32>
    %166 = vector.extract_strided_slice %162 {offsets = [0, 96], sizes = [8, 32], strides = [1, 1]} : vector<8x128xf32> to vector<8x32xf32>
    %167 = arith.mulf %164, %125 : vector<8x32xf32>
    %168 = arith.mulf %163, %165 : vector<8x32xf32>
    %169 = arith.addf %167, %168 : vector<8x32xf32>
    %170 = math.tanh %169 : vector<8x32xf32>
    %171 = arith.mulf %166, %170 : vector<8x32xf32>
    %c32 = arith.constant 32 : index
    %c0_62 = arith.constant 0 : index
    %172 = vector.load %arg10[%c32, %c0_62] : memref<64x128xf32, #tpu.memory_space<vmem>>, vector<8x128xf32>
    %cst_63 = arith.constant dense<0.000000e+00> : vector<8x128xf32>
    %173 = tpu.matmul %148, %11, %cst_63 {dimension_numbers = #tpu.dot_dimension_numbers<[1], [0], [0], [1], [0, 0, 1, 1], [], []>} : vector<8x32xf32>, vector<32x128xf32>, vector<8x128xf32> -> vector<8x128xf32>
    %174 = arith.addf %172, %173 : vector<8x128xf32>
    %175 = math.tanh %174 : vector<8x128xf32>
    %cst_64 = arith.constant 0.000000e+00 : f32
    %176 = vector.broadcast %cst_64 : f32 to vector<8x128xf32>
    %177 = arith.subf %176, %174 : vector<8x128xf32>
    %178 = math.exp %177 : vector<8x128xf32>
    %cst_65 = arith.constant 1.000000e+00 : f32
    %179 = vector.broadcast %cst_65 : f32 to vector<8x128xf32>
    %180 = arith.addf %179, %178 : vector<8x128xf32>
    %cst_66 = arith.constant 1.000000e+00 : f32
    %181 = vector.broadcast %cst_66 : f32 to vector<8x128xf32>
    %182 = arith.divf %181, %180 : vector<8x128xf32>
    %183 = arith.select %17, %175, %182 : vector<8x128xi1>, vector<8x128xf32>
    %184 = vector.extract_strided_slice %183 {offsets = [0, 0], sizes = [8, 32], strides = [1, 1]} : vector<8x128xf32> to vector<8x32xf32>
    %185 = vector.extract_strided_slice %183 {offsets = [0, 32], sizes = [8, 32], strides = [1, 1]} : vector<8x128xf32> to vector<8x32xf32>
    %186 = vector.extract_strided_slice %183 {offsets = [0, 64], sizes = [8, 32], strides = [1, 1]} : vector<8x128xf32> to vector<8x32xf32>
    %187 = vector.extract_strided_slice %183 {offsets = [0, 96], sizes = [8, 32], strides = [1, 1]} : vector<8x128xf32> to vector<8x32xf32>
    %188 = arith.mulf %185, %146 : vector<8x32xf32>
    %189 = arith.mulf %184, %186 : vector<8x32xf32>
    %190 = arith.addf %188, %189 : vector<8x32xf32>
    %191 = math.tanh %190 : vector<8x32xf32>
    %192 = arith.mulf %187, %191 : vector<8x32xf32>
    %c24_67 = arith.constant 24 : index
    %c0_68 = arith.constant 0 : index
    %193 = vector.load %arg11[%c24_67, %c0_68] : memref<64x32xf32, #tpu.memory_space<vmem>>, vector<8x32xf32>
    tpu.vector_store %arg11[%c24_67, %c0_68], %171 {strides = array<i32>} : memref<64x32xf32, #tpu.memory_space<vmem>>, vector<8x32xf32>,
    %c32_69 = arith.constant 32 : index
    %c0_70 = arith.constant 0 : index
    %194 = vector.load %arg12[%c32_69, %c0_70] : memref<64x32xf32, #tpu.memory_space<vmem>>, vector<8x32xf32>
    tpu.vector_store %arg12[%c32_69, %c0_70], %192 {strides = array<i32>} : memref<64x32xf32, #tpu.memory_space<vmem>>, vector<8x32xf32>,
    %c32_71 = arith.constant 32 : index
    %c0_72 = arith.constant 0 : index
    %195 = vector.load %arg9[%c32_71, %c0_72] : memref<64x128xf32, #tpu.memory_space<vmem>>, vector<8x128xf32>
    %cst_73 = arith.constant dense<0.000000e+00> : vector<8x128xf32>
    %196 = tpu.matmul %171, %10, %cst_73 {dimension_numbers = #tpu.dot_dimension_numbers<[1], [0], [0], [1], [0, 0, 1, 1], [], []>} : vector<8x32xf32>, vector<32x128xf32>, vector<8x128xf32> -> vector<8x128xf32>
    %197 = arith.addf %195, %196 : vector<8x128xf32>
    %198 = math.tanh %197 : vector<8x128xf32>
    %cst_74 = arith.constant 0.000000e+00 : f32
    %199 = vector.broadcast %cst_74 : f32 to vector<8x128xf32>
    %200 = arith.subf %199, %197 : vector<8x128xf32>
    %201 = math.exp %200 : vector<8x128xf32>
    %cst_75 = arith.constant 1.000000e+00 : f32
    %202 = vector.broadcast %cst_75 : f32 to vector<8x128xf32>
    %203 = arith.addf %202, %201 : vector<8x128xf32>
    %cst_76 = arith.constant 1.000000e+00 : f32
    %204 = vector.broadcast %cst_76 : f32 to vector<8x128xf32>
    %205 = arith.divf %204, %203 : vector<8x128xf32>
    %206 = arith.select %17, %198, %205 : vector<8x128xi1>, vector<8x128xf32>
    %207 = vector.extract_strided_slice %206 {offsets = [0, 0], sizes = [8, 32], strides = [1, 1]} : vector<8x128xf32> to vector<8x32xf32>
    %208 = vector.extract_strided_slice %206 {offsets = [0, 32], sizes = [8, 32], strides = [1, 1]} : vector<8x128xf32> to vector<8x32xf32>
    %209 = vector.extract_strided_slice %206 {offsets = [0, 64], sizes = [8, 32], strides = [1, 1]} : vector<8x128xf32> to vector<8x32xf32>
    %210 = vector.extract_strided_slice %206 {offsets = [0, 96], sizes = [8, 32], strides = [1, 1]} : vector<8x128xf32> to vector<8x32xf32>
    %211 = arith.mulf %208, %169 : vector<8x32xf32>
    %212 = arith.mulf %207, %209 : vector<8x32xf32>
    %213 = arith.addf %211, %212 : vector<8x32xf32>
    %214 = math.tanh %213 : vector<8x32xf32>
    %215 = arith.mulf %210, %214 : vector<8x32xf32>
    %c24_77 = arith.constant 24 : index
    %c0_78 = arith.constant 0 : index
    %216 = vector.load %arg10[%c24_77, %c0_78] : memref<64x128xf32, #tpu.memory_space<vmem>>, vector<8x128xf32>
    %cst_79 = arith.constant dense<0.000000e+00> : vector<8x128xf32>
    %217 = tpu.matmul %192, %11, %cst_79 {dimension_numbers = #tpu.dot_dimension_numbers<[1], [0], [0], [1], [0, 0, 1, 1], [], []>} : vector<8x32xf32>, vector<32x128xf32>, vector<8x128xf32> -> vector<8x128xf32>
    %218 = arith.addf %216, %217 : vector<8x128xf32>
    %219 = math.tanh %218 : vector<8x128xf32>
    %cst_80 = arith.constant 0.000000e+00 : f32
    %220 = vector.broadcast %cst_80 : f32 to vector<8x128xf32>
    %221 = arith.subf %220, %218 : vector<8x128xf32>
    %222 = math.exp %221 : vector<8x128xf32>
    %cst_81 = arith.constant 1.000000e+00 : f32
    %223 = vector.broadcast %cst_81 : f32 to vector<8x128xf32>
    %224 = arith.addf %223, %222 : vector<8x128xf32>
    %cst_82 = arith.constant 1.000000e+00 : f32
    %225 = vector.broadcast %cst_82 : f32 to vector<8x128xf32>
    %226 = arith.divf %225, %224 : vector<8x128xf32>
    %227 = arith.select %17, %219, %226 : vector<8x128xi1>, vector<8x128xf32>
    %228 = vector.extract_strided_slice %227 {offsets = [0, 0], sizes = [8, 32], strides = [1, 1]} : vector<8x128xf32> to vector<8x32xf32>
    %229 = vector.extract_strided_slice %227 {offsets = [0, 32], sizes = [8, 32], strides = [1, 1]} : vector<8x128xf32> to vector<8x32xf32>
    %230 = vector.extract_strided_slice %227 {offsets = [0, 64], sizes = [8, 32], strides = [1, 1]} : vector<8x128xf32> to vector<8x32xf32>
    %231 = vector.extract_strided_slice %227 {offsets = [0, 96], sizes = [8, 32], strides = [1, 1]} : vector<8x128xf32> to vector<8x32xf32>
    %232 = arith.mulf %229, %190 : vector<8x32xf32>
    %233 = arith.mulf %228, %230 : vector<8x32xf32>
    %234 = arith.addf %232, %233 : vector<8x32xf32>
    %235 = math.tanh %234 : vector<8x32xf32>
    %236 = arith.mulf %231, %235 : vector<8x32xf32>
    %c32_83 = arith.constant 32 : index
    %c0_84 = arith.constant 0 : index
    %237 = vector.load %arg11[%c32_83, %c0_84] : memref<64x32xf32, #tpu.memory_space<vmem>>, vector<8x32xf32>
    tpu.vector_store %arg11[%c32_83, %c0_84], %215 {strides = array<i32>} : memref<64x32xf32, #tpu.memory_space<vmem>>, vector<8x32xf32>,
    %c24_85 = arith.constant 24 : index
    %c0_86 = arith.constant 0 : index
    %238 = vector.load %arg12[%c24_85, %c0_86] : memref<64x32xf32, #tpu.memory_space<vmem>>, vector<8x32xf32>
    tpu.vector_store %arg12[%c24_85, %c0_86], %236 {strides = array<i32>} : memref<64x32xf32, #tpu.memory_space<vmem>>, vector<8x32xf32>,
    %c40_87 = arith.constant 40 : index
    %c0_88 = arith.constant 0 : index
    %239 = vector.load %arg9[%c40_87, %c0_88] : memref<64x128xf32, #tpu.memory_space<vmem>>, vector<8x128xf32>
    %cst_89 = arith.constant dense<0.000000e+00> : vector<8x128xf32>
    %240 = tpu.matmul %215, %10, %cst_89 {dimension_numbers = #tpu.dot_dimension_numbers<[1], [0], [0], [1], [0, 0, 1, 1], [], []>} : vector<8x32xf32>, vector<32x128xf32>, vector<8x128xf32> -> vector<8x128xf32>
    %241 = arith.addf %239, %240 : vector<8x128xf32>
    %242 = math.tanh %241 : vector<8x128xf32>
    %cst_90 = arith.constant 0.000000e+00 : f32
    %243 = vector.broadcast %cst_90 : f32 to vector<8x128xf32>
    %244 = arith.subf %243, %241 : vector<8x128xf32>
    %245 = math.exp %244 : vector<8x128xf32>
    %cst_91 = arith.constant 1.000000e+00 : f32
    %246 = vector.broadcast %cst_91 : f32 to vector<8x128xf32>
    %247 = arith.addf %246, %245 : vector<8x128xf32>
    %cst_92 = arith.constant 1.000000e+00 : f32
    %248 = vector.broadcast %cst_92 : f32 to vector<8x128xf32>
    %249 = arith.divf %248, %247 : vector<8x128xf32>
    %250 = arith.select %17, %242, %249 : vector<8x128xi1>, vector<8x128xf32>
    %251 = vector.extract_strided_slice %250 {offsets = [0, 0], sizes = [8, 32], strides = [1, 1]} : vector<8x128xf32> to vector<8x32xf32>
    %252 = vector.extract_strided_slice %250 {offsets = [0, 32], sizes = [8, 32], strides = [1, 1]} : vector<8x128xf32> to vector<8x32xf32>
    %253 = vector.extract_strided_slice %250 {offsets = [0, 64], sizes = [8, 32], strides = [1, 1]} : vector<8x128xf32> to vector<8x32xf32>
    %254 = vector.extract_strided_slice %250 {offsets = [0, 96], sizes = [8, 32], strides = [1, 1]} : vector<8x128xf32> to vector<8x32xf32>
    %255 = arith.mulf %252, %213 : vector<8x32xf32>
    %256 = arith.mulf %251, %253 : vector<8x32xf32>
    %257 = arith.addf %255, %256 : vector<8x32xf32>
    %258 = math.tanh %257 : vector<8x32xf32>
    %259 = arith.mulf %254, %258 : vector<8x32xf32>
    %c16_93 = arith.constant 16 : index
    %c0_94 = arith.constant 0 : index
    %260 = vector.load %arg10[%c16_93, %c0_94] : memref<64x128xf32, #tpu.memory_space<vmem>>, vector<8x128xf32>
    %cst_95 = arith.constant dense<0.000000e+00> : vector<8x128xf32>
    %261 = tpu.matmul %236, %11, %cst_95 {dimension_numbers = #tpu.dot_dimension_numbers<[1], [0], [0], [1], [0, 0, 1, 1], [], []>} : vector<8x32xf32>, vector<32x128xf32>, vector<8x128xf32> -> vector<8x128xf32>
    %262 = arith.addf %260, %261 : vector<8x128xf32>
    %263 = math.tanh %262 : vector<8x128xf32>
    %cst_96 = arith.constant 0.000000e+00 : f32
    %264 = vector.broadcast %cst_96 : f32 to vector<8x128xf32>
    %265 = arith.subf %264, %262 : vector<8x128xf32>
    %266 = math.exp %265 : vector<8x128xf32>
    %cst_97 = arith.constant 1.000000e+00 : f32
    %267 = vector.broadcast %cst_97 : f32 to vector<8x128xf32>
    %268 = arith.addf %267, %266 : vector<8x128xf32>
    %cst_98 = arith.constant 1.000000e+00 : f32
    %269 = vector.broadcast %cst_98 : f32 to vector<8x128xf32>
    %270 = arith.divf %269, %268 : vector<8x128xf32>
    %271 = arith.select %17, %263, %270 : vector<8x128xi1>, vector<8x128xf32>
    %272 = vector.extract_strided_slice %271 {offsets = [0, 0], sizes = [8, 32], strides = [1, 1]} : vector<8x128xf32> to vector<8x32xf32>
    %273 = vector.extract_strided_slice %271 {offsets = [0, 32], sizes = [8, 32], strides = [1, 1]} : vector<8x128xf32> to vector<8x32xf32>
    %274 = vector.extract_strided_slice %271 {offsets = [0, 64], sizes = [8, 32], strides = [1, 1]} : vector<8x128xf32> to vector<8x32xf32>
    %275 = vector.extract_strided_slice %271 {offsets = [0, 96], sizes = [8, 32], strides = [1, 1]} : vector<8x128xf32> to vector<8x32xf32>
    %276 = arith.mulf %273, %234 : vector<8x32xf32>
    %277 = arith.mulf %272, %274 : vector<8x32xf32>
    %278 = arith.addf %276, %277 : vector<8x32xf32>
    %279 = math.tanh %278 : vector<8x32xf32>
    %280 = arith.mulf %275, %279 : vector<8x32xf32>
    %c40_99 = arith.constant 40 : index
    %c0_100 = arith.constant 0 : index
    %281 = vector.load %arg11[%c40_99, %c0_100] : memref<64x32xf32, #tpu.memory_space<vmem>>, vector<8x32xf32>
    tpu.vector_store %arg11[%c40_99, %c0_100], %259 {strides = array<i32>} : memref<64x32xf32, #tpu.memory_space<vmem>>, vector<8x32xf32>,
    %c16_101 = arith.constant 16 : index
    %c0_102 = arith.constant 0 : index
    %282 = vector.load %arg12[%c16_101, %c0_102] : memref<64x32xf32, #tpu.memory_space<vmem>>, vector<8x32xf32>
    tpu.vector_store %arg12[%c16_101, %c0_102], %280 {strides = array<i32>} : memref<64x32xf32, #tpu.memory_space<vmem>>, vector<8x32xf32>,
    %c48_103 = arith.constant 48 : index
    %c0_104 = arith.constant 0 : index
    %283 = vector.load %arg9[%c48_103, %c0_104] : memref<64x128xf32, #tpu.memory_space<vmem>>, vector<8x128xf32>
    %cst_105 = arith.constant dense<0.000000e+00> : vector<8x128xf32>
    %284 = tpu.matmul %259, %10, %cst_105 {dimension_numbers = #tpu.dot_dimension_numbers<[1], [0], [0], [1], [0, 0, 1, 1], [], []>} : vector<8x32xf32>, vector<32x128xf32>, vector<8x128xf32> -> vector<8x128xf32>
    %285 = arith.addf %283, %284 : vector<8x128xf32>
    %286 = math.tanh %285 : vector<8x128xf32>
    %cst_106 = arith.constant 0.000000e+00 : f32
    %287 = vector.broadcast %cst_106 : f32 to vector<8x128xf32>
    %288 = arith.subf %287, %285 : vector<8x128xf32>
    %289 = math.exp %288 : vector<8x128xf32>
    %cst_107 = arith.constant 1.000000e+00 : f32
    %290 = vector.broadcast %cst_107 : f32 to vector<8x128xf32>
    %291 = arith.addf %290, %289 : vector<8x128xf32>
    %cst_108 = arith.constant 1.000000e+00 : f32
    %292 = vector.broadcast %cst_108 : f32 to vector<8x128xf32>
    %293 = arith.divf %292, %291 : vector<8x128xf32>
    %294 = arith.select %17, %286, %293 : vector<8x128xi1>, vector<8x128xf32>
    %295 = vector.extract_strided_slice %294 {offsets = [0, 0], sizes = [8, 32], strides = [1, 1]} : vector<8x128xf32> to vector<8x32xf32>
    %296 = vector.extract_strided_slice %294 {offsets = [0, 32], sizes = [8, 32], strides = [1, 1]} : vector<8x128xf32> to vector<8x32xf32>
    %297 = vector.extract_strided_slice %294 {offsets = [0, 64], sizes = [8, 32], strides = [1, 1]} : vector<8x128xf32> to vector<8x32xf32>
    %298 = vector.extract_strided_slice %294 {offsets = [0, 96], sizes = [8, 32], strides = [1, 1]} : vector<8x128xf32> to vector<8x32xf32>
    %299 = arith.mulf %296, %257 : vector<8x32xf32>
    %300 = arith.mulf %295, %297 : vector<8x32xf32>
    %301 = arith.addf %299, %300 : vector<8x32xf32>
    %302 = math.tanh %301 : vector<8x32xf32>
    %303 = arith.mulf %298, %302 : vector<8x32xf32>
    %c8_109 = arith.constant 8 : index
    %c0_110 = arith.constant 0 : index
    %304 = vector.load %arg10[%c8_109, %c0_110] : memref<64x128xf32, #tpu.memory_space<vmem>>, vector<8x128xf32>
    %cst_111 = arith.constant dense<0.000000e+00> : vector<8x128xf32>
    %305 = tpu.matmul %280, %11, %cst_111 {dimension_numbers = #tpu.dot_dimension_numbers<[1], [0], [0], [1], [0, 0, 1, 1], [], []>} : vector<8x32xf32>, vector<32x128xf32>, vector<8x128xf32> -> vector<8x128xf32>
    %306 = arith.addf %304, %305 : vector<8x128xf32>
    %307 = math.tanh %306 : vector<8x128xf32>
    %cst_112 = arith.constant 0.000000e+00 : f32
    %308 = vector.broadcast %cst_112 : f32 to vector<8x128xf32>
    %309 = arith.subf %308, %306 : vector<8x128xf32>
    %310 = math.exp %309 : vector<8x128xf32>
    %cst_113 = arith.constant 1.000000e+00 : f32
    %311 = vector.broadcast %cst_113 : f32 to vector<8x128xf32>
    %312 = arith.addf %311, %310 : vector<8x128xf32>
    %cst_114 = arith.constant 1.000000e+00 : f32
    %313 = vector.broadcast %cst_114 : f32 to vector<8x128xf32>
    %314 = arith.divf %313, %312 : vector<8x128xf32>
    %315 = arith.select %17, %307, %314 : vector<8x128xi1>, vector<8x128xf32>
    %316 = vector.extract_strided_slice %315 {offsets = [0, 0], sizes = [8, 32], strides = [1, 1]} : vector<8x128xf32> to vector<8x32xf32>
    %317 = vector.extract_strided_slice %315 {offsets = [0, 32], sizes = [8, 32], strides = [1, 1]} : vector<8x128xf32> to vector<8x32xf32>
    %318 = vector.extract_strided_slice %315 {offsets = [0, 64], sizes = [8, 32], strides = [1, 1]} : vector<8x128xf32> to vector<8x32xf32>
    %319 = vector.extract_strided_slice %315 {offsets = [0, 96], sizes = [8, 32], strides = [1, 1]} : vector<8x128xf32> to vector<8x32xf32>
    %320 = arith.mulf %317, %278 : vector<8x32xf32>
    %321 = arith.mulf %316, %318 : vector<8x32xf32>
    %322 = arith.addf %320, %321 : vector<8x32xf32>
    %323 = math.tanh %322 : vector<8x32xf32>
    %324 = arith.mulf %319, %323 : vector<8x32xf32>
    %c48_115 = arith.constant 48 : index
    %c0_116 = arith.constant 0 : index
    %325 = vector.load %arg11[%c48_115, %c0_116] : memref<64x32xf32, #tpu.memory_space<vmem>>, vector<8x32xf32>
    tpu.vector_store %arg11[%c48_115, %c0_116], %303 {strides = array<i32>} : memref<64x32xf32, #tpu.memory_space<vmem>>, vector<8x32xf32>,
    %c8_117 = arith.constant 8 : index
    %c0_118 = arith.constant 0 : index
    %326 = vector.load %arg12[%c8_117, %c0_118] : memref<64x32xf32, #tpu.memory_space<vmem>>, vector<8x32xf32>
    tpu.vector_store %arg12[%c8_117, %c0_118], %324 {strides = array<i32>} : memref<64x32xf32, #tpu.memory_space<vmem>>, vector<8x32xf32>,
    %c56_119 = arith.constant 56 : index
    %c0_120 = arith.constant 0 : index
    %327 = vector.load %arg9[%c56_119, %c0_120] : memref<64x128xf32, #tpu.memory_space<vmem>>, vector<8x128xf32>
    %cst_121 = arith.constant dense<0.000000e+00> : vector<8x128xf32>
    %328 = tpu.matmul %303, %10, %cst_121 {dimension_numbers = #tpu.dot_dimension_numbers<[1], [0], [0], [1], [0, 0, 1, 1], [], []>} : vector<8x32xf32>, vector<32x128xf32>, vector<8x128xf32> -> vector<8x128xf32>
    %329 = arith.addf %327, %328 : vector<8x128xf32>
    %330 = math.tanh %329 : vector<8x128xf32>
    %cst_122 = arith.constant 0.000000e+00 : f32
    %331 = vector.broadcast %cst_122 : f32 to vector<8x128xf32>
    %332 = arith.subf %331, %329 : vector<8x128xf32>
    %333 = math.exp %332 : vector<8x128xf32>
    %cst_123 = arith.constant 1.000000e+00 : f32
    %334 = vector.broadcast %cst_123 : f32 to vector<8x128xf32>
    %335 = arith.addf %334, %333 : vector<8x128xf32>
    %cst_124 = arith.constant 1.000000e+00 : f32
    %336 = vector.broadcast %cst_124 : f32 to vector<8x128xf32>
    %337 = arith.divf %336, %335 : vector<8x128xf32>
    %338 = arith.select %17, %330, %337 : vector<8x128xi1>, vector<8x128xf32>
    %339 = vector.extract_strided_slice %338 {offsets = [0, 0], sizes = [8, 32], strides = [1, 1]} : vector<8x128xf32> to vector<8x32xf32>
    %340 = vector.extract_strided_slice %338 {offsets = [0, 32], sizes = [8, 32], strides = [1, 1]} : vector<8x128xf32> to vector<8x32xf32>
    %341 = vector.extract_strided_slice %338 {offsets = [0, 64], sizes = [8, 32], strides = [1, 1]} : vector<8x128xf32> to vector<8x32xf32>
    %342 = vector.extract_strided_slice %338 {offsets = [0, 96], sizes = [8, 32], strides = [1, 1]} : vector<8x128xf32> to vector<8x32xf32>
    %343 = arith.mulf %340, %301 : vector<8x32xf32>
    %344 = arith.mulf %339, %341 : vector<8x32xf32>
    %345 = arith.addf %343, %344 : vector<8x32xf32>
    %346 = math.tanh %345 : vector<8x32xf32>
    %347 = arith.mulf %342, %346 : vector<8x32xf32>
    %c0_125 = arith.constant 0 : index
    %c0_126 = arith.constant 0 : index
    %348 = vector.load %arg10[%c0_125, %c0_126] : memref<64x128xf32, #tpu.memory_space<vmem>>, vector<8x128xf32>
    %cst_127 = arith.constant dense<0.000000e+00> : vector<8x128xf32>
    %349 = tpu.matmul %324, %11, %cst_127 {dimension_numbers = #tpu.dot_dimension_numbers<[1], [0], [0], [1], [0, 0, 1, 1], [], []>} : vector<8x32xf32>, vector<32x128xf32>, vector<8x128xf32> -> vector<8x128xf32>
    %350 = arith.addf %348, %349 : vector<8x128xf32>
    %351 = math.tanh %350 : vector<8x128xf32>
    %cst_128 = arith.constant 0.000000e+00 : f32
    %352 = vector.broadcast %cst_128 : f32 to vector<8x128xf32>
    %353 = arith.subf %352, %350 : vector<8x128xf32>
    %354 = math.exp %353 : vector<8x128xf32>
    %cst_129 = arith.constant 1.000000e+00 : f32
    %355 = vector.broadcast %cst_129 : f32 to vector<8x128xf32>
    %356 = arith.addf %355, %354 : vector<8x128xf32>
    %cst_130 = arith.constant 1.000000e+00 : f32
    %357 = vector.broadcast %cst_130 : f32 to vector<8x128xf32>
    %358 = arith.divf %357, %356 : vector<8x128xf32>
    %359 = arith.select %17, %351, %358 : vector<8x128xi1>, vector<8x128xf32>
    %360 = vector.extract_strided_slice %359 {offsets = [0, 0], sizes = [8, 32], strides = [1, 1]} : vector<8x128xf32> to vector<8x32xf32>
    %361 = vector.extract_strided_slice %359 {offsets = [0, 32], sizes = [8, 32], strides = [1, 1]} : vector<8x128xf32> to vector<8x32xf32>
    %362 = vector.extract_strided_slice %359 {offsets = [0, 64], sizes = [8, 32], strides = [1, 1]} : vector<8x128xf32> to vector<8x32xf32>
    %363 = vector.extract_strided_slice %359 {offsets = [0, 96], sizes = [8, 32], strides = [1, 1]} : vector<8x128xf32> to vector<8x32xf32>
    %364 = arith.mulf %361, %322 : vector<8x32xf32>
    %365 = arith.mulf %360, %362 : vector<8x32xf32>
    %366 = arith.addf %364, %365 : vector<8x32xf32>
    %367 = math.tanh %366 : vector<8x32xf32>
    %368 = arith.mulf %363, %367 : vector<8x32xf32>
    %c56_131 = arith.constant 56 : index
    %c0_132 = arith.constant 0 : index
    %369 = vector.load %arg11[%c56_131, %c0_132] : memref<64x32xf32, #tpu.memory_space<vmem>>, vector<8x32xf32>
    tpu.vector_store %arg11[%c56_131, %c0_132], %347 {strides = array<i32>} : memref<64x32xf32, #tpu.memory_space<vmem>>, vector<8x32xf32>,
    %c0_133 = arith.constant 0 : index
    %c0_134 = arith.constant 0 : index
    %370 = vector.load %arg12[%c0_133, %c0_134] : memref<64x32xf32, #tpu.memory_space<vmem>>, vector<8x32xf32>
    tpu.vector_store %arg12[%c0_133, %c0_134], %368 {strides = array<i32>} : memref<64x32xf32, #tpu.memory_space<vmem>>, vector<8x32xf32>,
    %c0_135 = arith.constant 0 : index
    %c0_136 = arith.constant 0 : index
    %371 = vector.load %arg7[%c0_135, %c0_136] : memref<1x128xf32, #tpu.memory_space<vmem>>, vector<1x128xf32>
    %c0_137 = arith.constant 0 : index
    %c0_138 = arith.constant 0 : index
    %372 = vector.load %arg11[%c0_137, %c0_138] : memref<64x32xf32, #tpu.memory_space<vmem>>, vector<64x32xf32>
    %cst_139 = arith.constant 0.000000e+00 : f32
    %373 = vector.broadcast %cst_139 : f32 to vector<64x32xf32>
    %374 = arith.maximumf %372, %373 : vector<64x32xf32>
    %c0_140 = arith.constant 0 : index
    %c0_141 = arith.constant 0 : index
    %375 = vector.load %arg5[%c0_140, %c0_141] : memref<32x128xf32, #tpu.memory_space<vmem>>, vector<32x128xf32>
    %cst_142 = arith.constant dense<0.000000e+00> : vector<64x128xf32>
    %376 = tpu.matmul %374, %375, %cst_142 {dimension_numbers = #tpu.dot_dimension_numbers<[1], [0], [0], [1], [0, 0, 1, 1], [], []>} : vector<64x32xf32>, vector<32x128xf32>, vector<64x128xf32> -> vector<64x128xf32>
    %377 = vector.broadcast %371 : vector<1x128xf32> to vector<64x128xf32>
    %378 = arith.addf %377, %376 : vector<64x128xf32>
    %c0_143 = arith.constant 0 : index
    %c0_144 = arith.constant 0 : index
    %379 = vector.load %arg12[%c0_143, %c0_144] : memref<64x32xf32, #tpu.memory_space<vmem>>, vector<64x32xf32>
    %cst_145 = arith.constant 0.000000e+00 : f32
    %380 = vector.broadcast %cst_145 : f32 to vector<64x32xf32>
    %381 = arith.maximumf %379, %380 : vector<64x32xf32>
    %c0_146 = arith.constant 0 : index
    %c0_147 = arith.constant 0 : index
    %382 = vector.load %arg6[%c0_146, %c0_147] : memref<32x128xf32, #tpu.memory_space<vmem>>, vector<32x128xf32>
    %cst_148 = arith.constant dense<0.000000e+00> : vector<64x128xf32>
    %383 = tpu.matmul %381, %382, %cst_148 {dimension_numbers = #tpu.dot_dimension_numbers<[1], [0], [0], [1], [0, 0, 1, 1], [], []>} : vector<64x32xf32>, vector<32x128xf32>, vector<64x128xf32> -> vector<64x128xf32>
    %384 = arith.addf %378, %383 : vector<64x128xf32>
    %c0_149 = arith.constant 0 : index
    %c0_150 = arith.constant 0 : index
    %385 = vector.load %arg8[%c0_149, %c0_150] : memref<64x128xf32, #tpu.memory_space<vmem>>, vector<64x128xf32>
    tpu.vector_store %arg8[%c0_149, %c0_150], %384 {strides = array<i32>} : memref<64x128xf32, #tpu.memory_space<vmem>>, vector<64x128xf32>,
    return
  }
}

</mosaic_0001>

<bundles_post_ra>
// kernel: tpu_custom_call.1
= control target key start
LH: loop header
LB: loop body
LE: loop exit
PB: predicated region body
PF: predicated region fallthrough
CT: control target
= control target key end

     0   :  { %13 = vsyncpa [#allocation7], 0  ;;  %s3577_s0 = inlined_call_operand.vmem [shape: f32[64,32], index: 0, kind: input, shape index: {}]   ;;  %s3578_s1 = inlined_call_operand.vmem [shape: f32[32,256], index: 1, kind: input, shape index: {}]   ;;  %s3579_s2 = inlined_call_operand.vmem [shape: f32[1,256], index: 2, kind: input, shape index: {}]   ;;  %s3580_s3 = inlined_call_operand.vmem [shape: f32[32,128], index: 3, kind: input, shape index: {}]   ;;  %s3581_s4 = inlined_call_operand.hbm [shape: f32[32,128], index: 4, kind: input, shape index: {}]   ;;  %s3582_s5 = inlined_call_operand.hbm [shape: f32[32,128], index: 5, kind: input, shape index: {}]   ;;  %s3583_s6 = inlined_call_operand.hbm [shape: f32[32,128], index: 6, kind: input, shape index: {}]   ;;  %s3584_s7 = inlined_call_operand.vmem [shape: f32[1,128], index: 7, kind: input, shape index: {}]   ;;  %s3585_s8 = inlined_call_operand.hbm [shape: f32[64,128], index: 8, kind: output, shape index: {}]  }
   0x1   :  { %14 = vsyncpa [#allocation10], 0 }
   0x2   :  { %15 = vsyncpa [#allocation8], 0  ;;  %s3008_s27 = smov [#allocation9]   ;;  %s3009_s29 = smov [#allocation6]  }
   0x3   :  { %s41_s28 = sshll.u32 %s3008_s27, 4  ;;  %s29_s30 = sshll.u32 %s3009_s29, 4  ;;  %s42_s28 = int_to_ptr.vmem [resolvable:$true] %s41_s28  ;;  %s3064_s30 = int_to_ptr.vmem [resolvable:$true] %s29_s30 }
   0x4   :  { %s2914_s11 = scalar_lea.hbm %s3582_s5, 512 }
   0x5   :  { %p2915_p0 = scmp.ne.s32.totalorder %s3582_s5, %s2914_s11  ;;  %p2918_p1 = scmp.lt.u32.totalorder %s2914_s11, %s3582_s5 }
   0x7   :  { %p2920_p2 = pnand %p2918_p1, %p2915_p0 }
   0x9   :  { %2923 = shalt.err (!%p2920_p2)
}
   0xa   :  { %s2924_s16 = scalar_lea.vmem %s42_s28, 512  ;;  %p2929_p4 = scmp.lt.s32.totalorder %s42_s28, %s42_s28 }
   0xb   :  { %p2925_p3 = scmp.ne.s32.totalorder %s42_s28, %s2924_s16  ;;  %p2930_p5 = scmp.lt.s32.totalorder %s2924_s16, %s2924_s16 }
   0xd   :  { %p2931_p6 = por %p2930_p5, %p2929_p4 }
   0xf   :  { %p2932_p7 = pnand %p2931_p6, %p2925_p3 }
  0x11   :  { %2935 = shalt.err (!%p2932_p7)
}
  0x12   :  { %s3010_s17 = smov 128   ;;  %s3011_s18 = smov 8  }
  0x13   :  { %47 = dma.hbm_to_vmem [thread:$0]  %s3582_s5, 512, %s42_s28, [#allocation10], %s3010_s17, %s3010_s17, %s3011_s18  }
  0x14   :  { %s2936_s23 = scalar_lea.hbm %s3581_s4, 512 }
  0x15   :  { %p2937_p8 = scmp.ne.s32.totalorder %s3581_s4, %s2936_s23  ;;  %p2940_p9 = scmp.lt.u32.totalorder %s2936_s23, %s3581_s4 }
  0x17   :  { %p2942_p10 = pnand %p2940_p9, %p2937_p8 }
  0x19   :  { %2945 = shalt.err (!%p2942_p10)
}
  0x1a   :  { %s2946_s29 = scalar_lea.vmem %s3064_s30, 512  ;;  %p2951_p12 = scmp.lt.s32.totalorder %s3064_s30, %s3064_s30 }
  0x1b   :  { %p2947_p11 = scmp.ne.s32.totalorder %s3064_s30, %s2946_s29  ;;  %p2952_p13 = scmp.lt.s32.totalorder %s2946_s29, %s2946_s29 }
  0x1d   :  { %p2953_p0 = por %p2952_p13, %p2951_p12 }
  0x1f   :  { %p2954_p1 = pnand %p2953_p0, %p2947_p11 }
  0x21   :  { %2957 = shalt.err (!%p2954_p1)
}
  0x22   :  { %35 = dma.hbm_to_vmem [thread:$0]  %s3581_s4, 512, %s3064_s30, [#allocation7], %s3010_s17, %s3010_s17, %s3011_s18  }
  0x23   :  { %s3012_s9 = smov [#allocation11]   ;;  %s2958_s13 = scalar_lea.hbm %s3583_s6, 512 }
  0x24   :  { %s53_s10 = sshll.u32 %s3012_s9, 4  ;;  %p2959_p2 = scmp.ne.s32.totalorder %s3583_s6, %s2958_s13  ;;  %s54_s10 = int_to_ptr.vmem [resolvable:$true] %s53_s10 }
  0x25   :  { %p2962_p3 = scmp.lt.u32.totalorder %s2958_s13, %s3583_s6 }
  0x27   :  { %p2964_p4 = pnand %p2962_p3, %p2959_p2 }
  0x29   :  { %2967 = shalt.err (!%p2964_p4)
}
  0x2a   :  { %s2968_s20 = scalar_lea.vmem %s54_s10, 512  ;;  %p2973_p6 = scmp.lt.s32.totalorder %s54_s10, %s54_s10 }
  0x2b   :  { %p2969_p5 = scmp.ne.s32.totalorder %s54_s10, %s2968_s20  ;;  %p2974_p7 = scmp.lt.s32.totalorder %s2968_s20, %s2968_s20 }
  0x2d   :  { %p2975_p8 = por %p2974_p7, %p2973_p6 }
  0x2f   :  { %p2976_p9 = pnand %p2975_p8, %p2969_p5 }
  0x31   :  { %2979 = shalt.err (!%p2976_p9)
}
  0x32   :  { %59 = dma.hbm_to_vmem [thread:$0]  %s3583_s6, 512, %s54_s10, [#allocation10], %s3010_s17, %s3010_s17, %s3011_s18  }
  0x33   :  { %3002 = dma.done.wait [#allocation7], 512  }
  0x34   :  { %3003 = vsyncadd [#allocation7], 4294966784 }
  0x35   :  { %3004 = dma.done.wait [#allocation10], 1024  }
  0x36   :  { %3005 = vsyncadd [#allocation10], 4294966272  ;;  %v3013_v0 = vmov 0.0   ;;  %v80_v1 = vld [vmem:[%s3578_s1 + $0x8] sm:$0xff]  ;;  %v82_v2 = vld [vmem:[%s3578_s1 + $0x18] sm:$0xff]  ;;  %vm99_vm0 = vcmask 261120   ;;  %v89_v31 = vlaneseq }
  0x37   :  { %212 = vmatprep.mubr.f32.mxu1 %v3013_v0  ;;  %188 = vmatprep.mubr.f32.mxu0 %v3013_v0  ;;  %v79_v3 = vld [vmem:[%s3578_s1] sm:$0xff]  ;;  %v2635_v4 = vpack.c.bf16 %v82_v2, %v80_v1  ;;  %v81_v5 = vld [vmem:[%s3578_s1 + $0x10] sm:$0xff]  ;;  %v84_v6 = vld [vmem:[%s3578_s1 + $0x28] sm:$0xff]  ;;  %v3014_v18 = vmov 0.0|0.0   ;;  %vm3015_vm1 = vmmov 0   ;;  %s3017_s9 = smov 32  }
  0x38   :  { %v86_v7 = vld [vmem:[%s3578_s1 + $0x38] sm:$0xff]  ;;  %v2637_v8 = vpack.c.bf16 %v81_v5, %v79_v3  ;;  %v83_v10 = vld [vmem:[%s3578_s1 + $0x20] sm:$0xff]  ;;  %v85_v11 = vld [vmem:[%s3578_s1 + $0x30] sm:$0xff]  ;;  %v90_v36 = vshrl.u32 %v89_v31, 7  ;;  %v262_v62 = vand.u32 127, %v89_v31  ;;  %s3018_s19 = smov [#allocation12]  }
  0x39   :  { %v2639_v9 = vpack.c.bf16 %v86_v7, %v84_v6  ;;  %2755 = vmatprep.subr.bf16.mxu1 %v2635_v4  ;;  %2636 = vmatprep.subr.bf16.mxu0 %v2635_v4  ;;  %v2641_v12 = vpack.c.bf16 %v85_v11, %v83_v10  ;;  %v253_v13 = vld [vmem:[%s3580_s3] sm:$0xff]  ;;  %v254_v14 = vld [vmem:[%s3580_s3 + $0x8] sm:$0xff]  ;;  %v255_v19 = vld [vmem:[%s3580_s3 + $0x10] sm:$0xff]  ;;  %s2263_s20 = sshll.u32 %s3018_s19, 4  ;;  %s2264_s20 = int_to_ptr.vmem [resolvable:$true] %s2263_s20 }
  0x3a   :  { %2757 = vmatpush1.bf16.msra.mxu1 %v2637_v8  ;;  %2638 = vmatpush1.bf16.msra.mxu0 %v2637_v8  ;;  %v75_v15 = vld [vmem:[%s3577_s0 + $0x20] sm:$0xff]  ;;  %v3151_v16 = vpack.c.bf16 %v254_v14, %v253_v13  ;;  %v256_v20 = vld [vmem:[%s3580_s3 + $0x18] sm:$0xff]  ;;  %v76_v21 = vld [vmem:[%s3577_s0 + $0x28] sm:$0xff]  ;;  %v91_v39 = vsub.s32 0, %v90_v36  ;;  %v95_v48 = vsub.s32 1, %v90_v36  ;;  %vm263_vm2 = vcmp.ge.s32.totalorder %v262_v62, 64  ;;  %p2985_p11 = scmp.lt.s32.totalorder %s2264_s20, %s2264_s20 }
  0x3b   :  { %2756 = vmatprep.subr.bf16.mxu1 %v2639_v9  ;;  %2640 = vmatprep.subr.bf16.mxu0 %v2639_v9  ;;  %v71_v17 = vld [vmem:[%s3577_s0] sm:$0xff]  ;;  %v3171_v22 = vpack.c.bf16 %v256_v20, %v255_v19  ;;  %v77_v23 = vld [vmem:[%s3577_s0 + $0x30] sm:$0xff]  ;;  %v78_v24 = vld [vmem:[%s3577_s0 + $0x38] sm:$0xff]  ;;  %vm264_vm3 = vcmp.lt.s32.totalorder %v262_v62, 96 }
  0x3c   :  { %v257_v25 = vld [vmem:[#allocation6] sm:$0xff]  ;;  %v258_v26 = vld [vmem:[#allocation6 + $0x8] sm:$0xff]  ;;  %v259_v28 = vld [vmem:[#allocation6 + $0x10] sm:$0xff] }
  0x3d   :  { %v3194_v27 = vpack.c.bf16 %v258_v26, %v257_v25  ;;  %v260_v29 = vld [vmem:[#allocation6 + $0x18] sm:$0xff]  ;;  %v87_v40 = vld [vmem:[%s3579_s2] sm:$0x3]  ;;  %vm3237_vm4 = vmand %vm263_vm2, %vm264_vm3  ;;  %s3016_s2 = smov 64  }
  0x3e   :  { %2758 = vmatpush1.bf16.msra.mxu1 %v2641_v12  ;;  %2642 = vmatpush1.bf16.msra.mxu0 %v2641_v12  ;;  %v3198_v30 = vpack.c.bf16 %v260_v29, %v259_v28  ;;  %v3229_v43 = vrot.slane %v87_v40, %v91_v39  ;;  %v3234_v52 = vrot.slane %v87_v40, %v95_v48 }
  0x3f   :  { %2643 = vmatprep.subr.bf16.mxu1 %v3014_v18  ;;  %2667 = vmatprep.subr.bf16.mxu0 %v3014_v18 }
  0x41   :  { %2280 = vmatmul.mubr.msk.f32.vlgmr.msra.gmra.mrb[0].mxu1 %vm99_vm0, %v75_v15  ;;  %2276 = vmatmul.mubr.msk.f32.vlgmr.msra.gmra.mrb[0].mxu0 %vm99_vm0, %v71_v17 }
  0x42   :  { %2645 = vmatpush3.bf16.msra.mxu1 %v3151_v16  ;;  %218 = vmatprep.mubr.f32.mxu1 %v3013_v0 }
  0x43   :  { %2646 = vmatprep.subr.bf16.mxu1 %v3014_v18  ;;  %194 = vmatprep.mubr.f32.mxu0 %v3013_v0 }
  0x44   :  { %2669 = vmatpush3.bf16.msra.mxu0 %v3151_v16 }
  0x45   :  { %2281 = vmatmul.mubr.msk.f32.gmra.mrb[2].mxu1 %vm99_vm0, %v76_v21  ;;  %2670 = vmatprep.subr.bf16.mxu0 %v3014_v18  ;;  %v72_v21 = vld [vmem:[%s3577_s0 + $0x8] sm:$0xff] }
  0x46   :  { %224 = vmatprep.mubr.f32.mxu1 %v3013_v0  ;;  %2648 = vmatpush3.bf16.msra.mxu1 %v3171_v22 }
  0x47   :  { %2649 = vmatprep.subr.bf16.mxu1 %v3014_v18  ;;  %2277 = vmatmul.mubr.msk.f32.gmra.mrb[2].mxu0 %vm99_vm0, %v72_v21 }
  0x48   :  { %2672 = vmatpush3.bf16.msra.mxu0 %v3171_v22  ;;  %200 = vmatprep.mubr.f32.mxu0 %v3013_v0 }
  0x49   :  { %2282 = vmatmul.mubr.msk.f32.gmra.mrb[4].mxu1 %vm99_vm0, %v77_v23  ;;  %2679 = vmatprep.subr.bf16.mxu0 %v3014_v18 }
  0x4a   :  { %230 = vmatprep.mubr.f32.mxu1 %v3013_v0 }
  0x4d   :  { %2283 = vmatmul.mubr.msk.f32.gmra.mrb[6].mxu1 %vm99_vm0, %v78_v24 }
  0x4e   :  { %2427 = vmatprep.mubr.msk.f32.mxu1 %vm3015_vm1, %v3013_v0 }
  0x51   :  { %2428 = vmatmul.mubr.f32.vlgmr.msra.gmra.mrb[8].mxu1 %v3013_v0 }
  0x52   :  { %2651 = vmatpush3.bf16.msra.mxu1 %v3194_v27  ;;  %2438 = vmatprep.mubr.msk.f32.mxu1 %vm3015_vm1, %v3013_v0 }
  0x53   :  { %2652 = vmatprep.subr.bf16.mxu1 %v3014_v18 }
  0x56   :  { %2654 = vmatpush3.bf16.msra.mxu1 %v3198_v30 }
  0x57   :  { %2655 = vmatprep.subr.bf16.mxu1 %v3014_v18 }
  0x59   :  { %2439 = vmatmul.mubr.f32.vlgmr.msra.gmra.mrb[10].mxu1 %v3013_v0 }
  0x5a   :  { %2657 = vmatpush3.bf16.msra.mxu1 %v3151_v16  ;;  %2449 = vmatprep.mubr.msk.f32.mxu1 %vm3015_vm1, %v3013_v0 }
  0x5b   :  { %2658 = vmatprep.subr.bf16.mxu1 %v3014_v18 }
  0x5e   :  { %2660 = vmatpush3.bf16.msra.mxu1 %v3171_v22 }
  0x5f   :  { %2661 = vmatprep.subr.bf16.mxu1 %v3014_v18 }
 0x114   :  { %v3212_v32 = vpop.f32.mrb[0].mxu1  ;;  %v190_v33 = vpop.f32.mrb[0].mxu0 }
 0x115   :  { %v3214_v34 = vpop.f32.mrb[1].mxu1  ;;  %v3216_v35 = vpop.f32.mrb[1].mxu0  ;;  %v191_v46 = vadd.f32 %v190_v33, %v3229_v43 }
 0x118   :  { %v3218_v37 = vpop.f32.mrb[2].mxu1 }
 0x119   :  { %v3220_v38 = vpop.f32.mrb[3].mxu1 }
 0x11a   :  { %v196_v31 = vpop.f32.mrb[2].mxu0 }
 0x11b   :  { %v3280_v39 = vpop.f32.mrb[3].mxu0  ;;  %v197_v40 = vadd.f32 %v196_v31, %v3229_v43 }
 0x11c   :  { %v3225_v41 = vpop.f32.mrb[4].mxu1 }
 0x11d   :  { %v3227_v42 = vpop.f32.mrb[5].mxu1 }
 0x120   :  { %v3231_v44 = vpop.f32.mrb[6].mxu1 }
 0x121   :  { %v234_v45 = vpop.f32.mrb[7].mxu1 }
 0x122   :  { %v235_v54 = vadd.f32 %v234_v45, %v3234_v52 }
 0x124   :  { %v336_v47 = vpop.f32.mrb[8].mxu1 }
 0x125   :  { %v340_v49 = vadd.f32 %v336_v47, %v191_v46  ;;  %v2429_v50 = vpop.f32.mrb[9].mxu1 }
 0x126   :  { %v229_v50 = vadd.f32 %v3227_v42, %v3234_v52 }
 0x127   :  { %v342_v51 = vsub.f32 0.0, %v340_v49 }
 0x129   :  { %v343_v53 = vmul.f32 1.442695, %v342_v51 }
 0x12b   :  { %2786 = vpow2.f32 %v343_v53 }
 0x12c   :  { %v433_v55 = vpop.f32.mrb[10].mxu1 }
 0x12d   :  { %v437_v56 = vadd.f32 %v433_v55, %v235_v54  ;;  %v2440_v57 = vpop.f32.mrb[11].mxu1 }
 0x12f   :  { %v439_v58 = vsub.f32 0.0, %v437_v56 }
 0x131   :  { %v440_v59 = vmul.f32 1.442695, %v439_v58 }
 0x133   :  { %2788 = vpow2.f32 %v440_v59 }
 0x134   :  { %2790 = vtanh.f32 %v340_v49 }
 0x135   :  { %v2787_v60 = vpop.eup %2786 }
 0x136   :  { %v345_v61 = vadd.f32 1.0, %v2787_v60 }
 0x138   :  { %2792 = vrcp.f32 %v345_v61 }
 0x139   :  { %2794 = vtanh.f32 %v437_v56 }
 0x13d   :  { %v2789_v63 = vpop.eup %2788 }
 0x13e   :  { %v442_v1 = vadd.f32 1.0, %v2789_v63  ;;  %v2791_v3 = vpop.eup %2790 }
 0x140   :  { %2796 = vrcp.f32 %v442_v1 }
 0x142   :  { %v2793_v4 = vpop.eup %2792 }
 0x143   :  { %v348_v5 = vsel %vm3237_vm4, %v2791_v3, %v2793_v4  ;;  %v2795_v6 = vpop.eup %2794 }
 0x144   :  { %351 = vrot.lane.b32.xlu0 %v348_v5, %s3016_s2  ;;  %v349_v13 = vmul.f32 0.0, %v348_v5 }
 0x14a   :  { %v2797_v7 = vpop.eup %2796 }
 0x14b   :  { %v445_v8 = vsel %vm3237_vm4, %v2795_v6, %v2797_v7 }
 0x14c   :  { %448 = vrot.lane.b32.xlu0 %v445_v8, %s3016_s2  ;;  %v446_v17 = vmul.f32 0.0, %v445_v8 }
 0x1b6   :  { %v352_v9 = vpop.permute.xlu0 %351 }
 0x1b7   :  { %v354_v10 = vmul.f32 %v352_v9, %v348_v5 }
 0x1b9   :  { %356 = vrot.lane.b32.xlu1 %v354_v10, %s3017_s9 }
 0x1be   :  { %v449_v11 = vpop.permute.xlu0 %448 }
 0x1bf   :  { %v451_v12 = vmul.f32 %v449_v11, %v445_v8 }
 0x1c1   :  { %453 = vrot.lane.b32.xlu1 %v451_v12, %s3017_s9 }
 0x22b   :  { %v357_v14 = vpop.permute.xlu1 %356 }
 0x22c   :  { %v3249_v15 = vadd.f32 %v357_v14, %v349_v13  ;;  %v73_v14 = vld [vmem:[%s3577_s0 + $0x10] sm:$0xff] }
 0x22d   :  { %2278 = vmatmul.mubr.msk.f32.gmra.mrb[4].mxu0 %vm99_vm0, %v73_v14 }
 0x22e   :  { %2798 = vtanh.f32 %v3249_v15  ;;  %206 = vmatprep.mubr.f32.mxu0 %v3013_v0 }
 0x233   :  { %v454_v19 = vpop.permute.xlu1 %453 }
 0x234   :  { %v3252_v20 = vadd.f32 %v454_v19, %v446_v17 }
 0x236   :  { %2800 = vtanh.f32 %v3252_v20 }
 0x238   :  { %v2799_v23 = vpop.eup %2798 }
 0x239   :  { %362 = vrot.lane.b32.xlu0 %v2799_v23, %s3016_s2 }
 0x240   :  { %v2801_v24 = vpop.eup %2800 }
 0x241   :  { %459 = vrot.lane.b32.xlu1 %v2801_v24, %s3016_s2 }
 0x2ab   :  { %v363_v25 = vpop.permute.xlu0 %362 }
 0x2ac   :  { %v365_v26 = vmul.f32 %v363_v25, %v348_v5 }
 0x2ae   :  { %464 = vrot.lane.b32.xlu0 %v365_v26, %s3017_s9 }
 0x2b3   :  { %v460_v28 = vpop.permute.xlu1 %459 }
 0x2b4   :  { %v462_v29 = vmul.f32 %v460_v28, %v445_v8 }
 0x2b6   :  { %469 = vrot.lane.b32.xlu1 %v462_v29, %s3017_s9 }
 0x300   :  { %v202_v25 = vpop.f32.mrb[4].mxu0 }
 0x301   :  { %v3316_v26 = vpop.f32.mrb[5].mxu0 }
 0x320   :  { %v465_v33 = vpop.permute.xlu0 %464 }
 0x321   :  { %467 = vst.msk [vmem:[#allocation4] sm:$0xff] %vm99_vm0, %v465_v33  ;;  %2450 = vmatmul.mubr.msk.f32.vlgmr.msra.gmra.mrb[12].mxu1 %vm99_vm0, %v465_v33 }
 0x322   :  { %2663 = vmatpush3.bf16.msra.mxu1 %v3194_v27  ;;  %2460 = vmatprep.mubr.msk.f32.mxu1 %vm3015_vm1, %v3013_v0 }
 0x323   :  { %2664 = vmatprep.subr.bf16.mxu1 %v3014_v18 }
 0x326   :  { %2666 = vmatpush3.bf16.msra.mxu1 %v3198_v30 }
 0x327   :  { %2673 = vmatprep.subr.bf16.mxu1 %v3014_v18 }
 0x328   :  { %v470_v36 = vpop.permute.xlu1 %469 }
 0x329   :  { %472 = vst.msk [vmem:[#allocation5 + $0x38] sm:$0xff] %vm99_vm0, %v470_v36  ;;  %2461 = vmatmul.mubr.msk.f32.vlgmr.msra.gmra.mrb[14].mxu1 %vm99_vm0, %v470_v36  ;;  %v203_v36 = vadd.f32 %v202_v25, %v3229_v43 }
 0x32a   :  { %2675 = vmatpush3.bf16.msra.mxu1 %v3194_v27  ;;  %2482 = vmatprep.mubr.msk.f32.mxu1 %vm3015_vm1, %v3013_v0 }
 0x32b   :  { %2676 = vmatprep.subr.bf16.mxu1 %v3014_v18 }
 0x32e   :  { %2678 = vmatpush3.bf16.msra.mxu1 %v3198_v30 }
 0x32f   :  { %2685 = vmatprep.subr.bf16.mxu1 %v3014_v18 }
 0x3f4   :  { %v542_v45 = vpop.f32.mrb[12].mxu1 }
 0x3f5   :  { %v546_v46 = vadd.f32 %v542_v45, %v197_v40  ;;  %v2451_v47 = vpop.f32.mrb[13].mxu1 }
 0x3f7   :  { %v548_v48 = vsub.f32 0.0, %v546_v46 }
 0x3f9   :  { %v549_v49 = vmul.f32 1.442695, %v548_v48 }
 0x3fb   :  { %2802 = vpow2.f32 %v549_v49  ;;  %v223_v49 = vadd.f32 %v3220_v38, %v3234_v52 }
 0x3fc   :  { %v641_v51 = vpop.f32.mrb[14].mxu1 }
 0x3fd   :  { %v645_v53 = vadd.f32 %v641_v51, %v229_v50  ;;  %v2462_v54 = vpop.f32.mrb[15].mxu1 }
 0x3ff   :  { %v647_v55 = vsub.f32 0.0, %v645_v53 }
 0x401   :  { %v648_v56 = vmul.f32 1.442695, %v647_v55 }
 0x403   :  { %2804 = vpow2.f32 %v648_v56 }
 0x404   :  { %2806 = vtanh.f32 %v546_v46 }
 0x405   :  { %v2803_v57 = vpop.eup %2802 }
 0x406   :  { %v551_v58 = vadd.f32 1.0, %v2803_v57 }
 0x408   :  { %2808 = vrcp.f32 %v551_v58 }
 0x409   :  { %2810 = vtanh.f32 %v645_v53 }
 0x40d   :  { %v2805_v59 = vpop.eup %2804 }
 0x40e   :  { %v650_v60 = vadd.f32 1.0, %v2805_v59  ;;  %v2807_v61 = vpop.eup %2806 }
 0x410   :  { %2812 = vrcp.f32 %v650_v60 }
 0x412   :  { %v2809_v62 = vpop.eup %2808 }
 0x413   :  { %v554_v42 = vsel %vm3237_vm4, %v2807_v61, %v2809_v62  ;;  %v2811_v63 = vpop.eup %2810 }
 0x414   :  { %557 = vrot.lane.b32.xlu0 %v554_v42, %s3016_s2  ;;  %v555_v8 = vmul.f32 %v554_v42, %v3249_v15  ;;  %v74_v15 = vld [vmem:[%s3577_s0 + $0x18] sm:$0xff] }
 0x415   :  { %2279 = vmatmul.mubr.msk.f32.gmra.mrb[6].mxu0 %vm99_vm0, %v74_v15 }
 0x416   :  { %2471 = vmatprep.mubr.msk.f32.mxu0 %vm3015_vm1, %v3013_v0 }
 0x41a   :  { %v2813_v1 = vpop.eup %2812 }
 0x41b   :  { %v653_v3 = vsel %vm3237_vm4, %v2811_v63, %v2813_v1 }
 0x41c   :  { %656 = vrot.lane.b32.xlu1 %v653_v3, %s3016_s2  ;;  %v654_v11 = vmul.f32 %v653_v3, %v3252_v20 }
 0x486   :  { %v558_v4 = vpop.permute.xlu0 %557 }
 0x487   :  { %v560_v5 = vmul.f32 %v558_v4, %v554_v42 }
 0x489   :  { %562 = vrot.lane.b32.xlu0 %v560_v5, %s3017_s9 }
 0x48e   :  { %v657_v6 = vpop.permute.xlu1 %656 }
 0x48f   :  { %v659_v7 = vmul.f32 %v657_v6, %v653_v3 }
 0x491   :  { %661 = vrot.lane.b32.xlu1 %v659_v7, %s3017_s9 }
 0x4e8   :  { %v3318_v28 = vpop.f32.mrb[6].mxu0 }
 0x4e9   :  { %v3320_v29 = vpop.f32.mrb[7].mxu0 }
 0x4fb   :  { %v563_v9 = vpop.permute.xlu0 %562 }
 0x4fc   :  { %v3294_v10 = vadd.f32 %v563_v9, %v555_v8 }
 0x4fe   :  { %2814 = vtanh.f32 %v3294_v10 }
 0x503   :  { %v662_v12 = vpop.permute.xlu1 %661 }
 0x504   :  { %v3298_v13 = vadd.f32 %v662_v12, %v654_v11 }
 0x506   :  { %2816 = vtanh.f32 %v3298_v13 }
 0x508   :  { %v2815_v17 = vpop.eup %2814 }
 0x509   :  { %568 = vrot.lane.b32.xlu0 %v2815_v17, %s3016_s2 }
 0x510   :  { %v2817_v19 = vpop.eup %2816 }
 0x511   :  { %667 = vrot.lane.b32.xlu1 %v2817_v19, %s3016_s2 }
 0x57b   :  { %v569_v20 = vpop.permute.xlu0 %568 }
 0x57c   :  { %v571_v21 = vmul.f32 %v569_v20, %v554_v42 }
 0x57e   :  { %672 = vrot.lane.b32.xlu0 %v571_v21, %s3017_s9 }
 0x583   :  { %v668_v23 = vpop.permute.xlu1 %667 }
 0x584   :  { %v670_v24 = vmul.f32 %v668_v23, %v653_v3  ;;  %v209_v23 = vadd.f32 %v3318_v28, %v3229_v43 }
 0x586   :  { %677 = vrot.lane.b32.xlu1 %v670_v24, %s3017_s9 }
 0x5f0   :  { %v673_v31 = vpop.permute.xlu0 %672 }
 0x5f1   :  { %675 = vst.msk [vmem:[#allocation4 + $0x8] sm:$0xff] %vm99_vm0, %v673_v31  ;;  %2472 = vmatmul.mubr.msk.f32.vlgmr.msra.gmra.mrb[8].mxu0 %vm99_vm0, %v673_v31 }
 0x5f2   :  { %2681 = vmatpush3.bf16.msra.mxu0 %v3151_v16  ;;  %2493 = vmatprep.mubr.msk.f32.mxu0 %vm3015_vm1, %v3013_v0 }
 0x5f3   :  { %2682 = vmatprep.subr.bf16.mxu0 %v3014_v18 }
 0x5f6   :  { %2684 = vmatpush3.bf16.msra.mxu0 %v3171_v22 }
 0x5f7   :  { %2691 = vmatprep.subr.bf16.mxu0 %v3014_v18 }
 0x5f8   :  { %v678_v33 = vpop.permute.xlu1 %677 }
 0x5f9   :  { %680 = vst.msk [vmem:[#allocation5 + $0x30] sm:$0xff] %vm99_vm0, %v678_v33  ;;  %2483 = vmatmul.mubr.msk.f32.vlgmr.msra.gmra.mrb[16].mxu1 %vm99_vm0, %v678_v33 }
 0x5fa   :  { %2687 = vmatpush3.bf16.msra.mxu1 %v3194_v27  ;;  %2504 = vmatprep.mubr.msk.f32.mxu1 %vm3015_vm1, %v3013_v0 }
 0x5fb   :  { %2688 = vmatprep.subr.bf16.mxu1 %v3014_v18 }
 0x5fe   :  { %2690 = vmatpush3.bf16.msra.mxu1 %v3198_v30 }
 0x5ff   :  { %2697 = vmatprep.subr.bf16.mxu1 %v3014_v18 }
 0x6c4   :  { %v750_v40 = vpop.f32.mrb[8].mxu0 }
 0x6c5   :  { %v754_v45 = vadd.f32 %v750_v40, %v203_v36  ;;  %v2473_v46 = vpop.f32.mrb[9].mxu0  ;;  %v217_v40 = vadd.f32 %v3214_v34, %v3234_v52 }
 0x6c7   :  { %v756_v47 = vsub.f32 0.0, %v754_v45 }
 0x6c9   :  { %v757_v48 = vmul.f32 1.442695, %v756_v47 }
 0x6cb   :  { %2818 = vpow2.f32 %v757_v48 }
 0x6cc   :  { %v849_v50 = vpop.f32.mrb[16].mxu1 }
 0x6cd   :  { %v853_v51 = vadd.f32 %v849_v50, %v223_v49  ;;  %v2484_v53 = vpop.f32.mrb[17].mxu1 }
 0x6cf   :  { %v855_v54 = vsub.f32 0.0, %v853_v51 }
 0x6d1   :  { %v856_v55 = vmul.f32 1.442695, %v855_v54 }
 0x6d3   :  { %2820 = vpow2.f32 %v856_v55 }
 0x6d4   :  { %2822 = vtanh.f32 %v754_v45 }
 0x6d5   :  { %v2819_v56 = vpop.eup %2818 }
 0x6d6   :  { %v759_v57 = vadd.f32 1.0, %v2819_v56 }
 0x6d8   :  { %2824 = vrcp.f32 %v759_v57 }
 0x6d9   :  { %2826 = vtanh.f32 %v853_v51 }
 0x6dd   :  { %v2821_v58 = vpop.eup %2820 }
 0x6de   :  { %v858_v59 = vadd.f32 1.0, %v2821_v58  ;;  %v2823_v60 = vpop.eup %2822 }
 0x6e0   :  { %2828 = vrcp.f32 %v858_v59 }
 0x6e2   :  { %v2825_v61 = vpop.eup %2824 }
 0x6e3   :  { %v762_v38 = vsel %vm3237_vm4, %v2823_v60, %v2825_v61  ;;  %v2827_v62 = vpop.eup %2826 }
 0x6e4   :  { %765 = vrot.lane.b32.xlu0 %v762_v38, %s3016_s2  ;;  %v763_v6 = vmul.f32 %v762_v38, %v3294_v10 }
 0x6ea   :  { %v2829_v42 = vpop.eup %2828 }
 0x6eb   :  { %v861_v63 = vsel %vm3237_vm4, %v2827_v62, %v2829_v42 }
 0x6ec   :  { %864 = vrot.lane.b32.xlu1 %v861_v63, %s3016_s2  ;;  %v862_v9 = vmul.f32 %v861_v63, %v3298_v13 }
 0x756   :  { %v766_v1 = vpop.permute.xlu0 %765 }
 0x757   :  { %v768_v3 = vmul.f32 %v766_v1, %v762_v38 }
 0x759   :  { %770 = vrot.lane.b32.xlu0 %v768_v3, %s3017_s9 }
 0x75e   :  { %v865_v4 = vpop.permute.xlu1 %864 }
 0x75f   :  { %v867_v5 = vmul.f32 %v865_v4, %v861_v63 }
 0x761   :  { %869 = vrot.lane.b32.xlu1 %v867_v5, %s3017_s9 }
 0x7cb   :  { %v771_v7 = vpop.permute.xlu0 %770 }
 0x7cc   :  { %v3350_v8 = vadd.f32 %v771_v7, %v763_v6 }
 0x7ce   :  { %2830 = vtanh.f32 %v3350_v8 }
 0x7d3   :  { %v870_v11 = vpop.permute.xlu1 %869 }
 0x7d4   :  { %v3354_v12 = vadd.f32 %v870_v11, %v862_v9 }
 0x7d6   :  { %2832 = vtanh.f32 %v3354_v12 }
 0x7d8   :  { %v2831_v14 = vpop.eup %2830 }
 0x7d9   :  { %776 = vrot.lane.b32.xlu0 %v2831_v14, %s3016_s2 }
 0x7e0   :  { %v2833_v17 = vpop.eup %2832 }
 0x7e1   :  { %875 = vrot.lane.b32.xlu1 %v2833_v17, %s3016_s2  ;;  %v215_v17 = vadd.f32 %v3212_v32, %v3229_v43 }
 0x84b   :  { %v777_v15 = vpop.permute.xlu0 %776 }
 0x84c   :  { %v779_v10 = vmul.f32 %v777_v15, %v762_v38 }
 0x84e   :  { %880 = vrot.lane.b32.xlu0 %v779_v10, %s3017_s9 }
 0x853   :  { %v876_v19 = vpop.permute.xlu1 %875 }
 0x854   :  { %v878_v20 = vmul.f32 %v876_v19, %v861_v63 }
 0x856   :  { %885 = vrot.lane.b32.xlu1 %v878_v20, %s3017_s9 }
 0x8c0   :  { %v881_v13 = vpop.permute.xlu0 %880 }
 0x8c1   :  { %883 = vst.msk [vmem:[#allocation4 + $0x10] sm:$0xff] %vm99_vm0, %v881_v13  ;;  %2494 = vmatmul.mubr.msk.f32.vlgmr.msra.gmra.mrb[10].mxu0 %vm99_vm0, %v881_v13 }
 0x8c2   :  { %2693 = vmatpush3.bf16.msra.mxu0 %v3151_v16  ;;  %2515 = vmatprep.mubr.msk.f32.mxu0 %vm3015_vm1, %v3013_v0 }
 0x8c3   :  { %2694 = vmatprep.subr.bf16.mxu0 %v3014_v18 }
 0x8c6   :  { %2696 = vmatpush3.bf16.msra.mxu0 %v3171_v22 }
 0x8c7   :  { %2703 = vmatprep.subr.bf16.mxu0 %v3014_v18 }
 0x8c8   :  { %v886_v21 = vpop.permute.xlu1 %885 }
 0x8c9   :  { %888 = vst.msk [vmem:[#allocation5 + $0x28] sm:$0xff] %vm99_vm0, %v886_v21  ;;  %2505 = vmatmul.mubr.msk.f32.vlgmr.msra.gmra.mrb[18].mxu1 %vm99_vm0, %v886_v21  ;;  %v211_v21 = vadd.f32 %v3320_v29, %v3234_v52 }
 0x8ca   :  { %2699 = vmatpush3.bf16.msra.mxu1 %v3194_v27  ;;  %2526 = vmatprep.mubr.msk.f32.mxu1 %vm3015_vm1, %v3013_v0 }
 0x8cb   :  { %2700 = vmatprep.subr.bf16.mxu1 %v3014_v18 }
 0x8ce   :  { %2702 = vmatpush3.bf16.msra.mxu1 %v3198_v30 }
 0x8cf   :  { %2709 = vmatprep.subr.bf16.mxu1 %v3014_v18 }
 0x994   :  { %v958_v24 = vpop.f32.mrb[10].mxu0 }
 0x995   :  { %v962_v25 = vadd.f32 %v958_v24, %v209_v23  ;;  %v2495_v31 = vpop.f32.mrb[11].mxu0 }
 0x997   :  { %v964_v33 = vsub.f32 0.0, %v962_v25 }
 0x999   :  { %v965_v36 = vmul.f32 1.442695, %v964_v33 }
 0x99b   :  { %2834 = vpow2.f32 %v965_v36 }
 0x99c   :  { %v1057_v45 = vpop.f32.mrb[18].mxu1 }
 0x99d   :  { %v1061_v46 = vadd.f32 %v1057_v45, %v217_v40  ;;  %v2506_v47 = vpop.f32.mrb[19].mxu1 }
 0x99f   :  { %v1063_v48 = vsub.f32 0.0, %v1061_v46 }
 0x9a1   :  { %v1064_v49 = vmul.f32 1.442695, %v1063_v48 }
 0x9a3   :  { %2836 = vpow2.f32 %v1064_v49 }
 0x9a4   :  { %2838 = vtanh.f32 %v962_v25 }
 0x9a5   :  { %v2835_v50 = vpop.eup %2834 }
 0x9a6   :  { %v967_v51 = vadd.f32 1.0, %v2835_v50 }
 0x9a8   :  { %2840 = vrcp.f32 %v967_v51 }
 0x9a9   :  { %2842 = vtanh.f32 %v1061_v46 }
 0x9ad   :  { %v2837_v28 = vpop.eup %2836 }
 0x9ae   :  { %v1066_v53 = vadd.f32 1.0, %v2837_v28  ;;  %v2839_v54 = vpop.eup %2838 }
 0x9b0   :  { %2844 = vrcp.f32 %v1066_v53 }
 0x9b2   :  { %v2841_v55 = vpop.eup %2840 }
 0x9b3   :  { %v970_v34 = vsel %vm3237_vm4, %v2839_v54, %v2841_v55  ;;  %v2843_v56 = vpop.eup %2842 }
 0x9b4   :  { %973 = vrot.lane.b32.xlu0 %v970_v34, %s3016_s2  ;;  %v971_v62 = vmul.f32 %v970_v34, %v3350_v8 }
 0x9ba   :  { %v2845_v57 = vpop.eup %2844 }
 0x9bb   :  { %v1069_v58 = vsel %vm3237_vm4, %v2843_v56, %v2845_v57 }
 0x9bc   :  { %1072 = vrot.lane.b32.xlu1 %v1069_v58, %s3016_s2  ;;  %v1070_v1 = vmul.f32 %v1069_v58, %v3354_v12 }
 0xa26   :  { %v974_v59 = vpop.permute.xlu0 %973 }
 0xa27   :  { %v976_v60 = vmul.f32 %v974_v59, %v970_v34 }
 0xa29   :  { %978 = vrot.lane.b32.xlu0 %v976_v60, %s3017_s9 }
 0xa2e   :  { %v1073_v61 = vpop.permute.xlu1 %1072 }
 0xa2f   :  { %v1075_v38 = vmul.f32 %v1073_v61, %v1069_v58 }
 0xa31   :  { %1077 = vrot.lane.b32.xlu1 %v1075_v38, %s3017_s9 }
 0xa9b   :  { %v979_v42 = vpop.permute.xlu0 %978 }
 0xa9c   :  { %v3390_v63 = vadd.f32 %v979_v42, %v971_v62 }
 0xa9e   :  { %2846 = vtanh.f32 %v3390_v63 }
 0xaa3   :  { %v1078_v3 = vpop.permute.xlu1 %1077 }
 0xaa4   :  { %v3394_v4 = vadd.f32 %v1078_v3, %v1070_v1 }
 0xaa6   :  { %2848 = vtanh.f32 %v3394_v4 }
 0xaa8   :  { %v2847_v5 = vpop.eup %2846 }
 0xaa9   :  { %984 = vrot.lane.b32.xlu0 %v2847_v5, %s3016_s2 }
 0xab0   :  { %v2849_v6 = vpop.eup %2848 }
 0xab1   :  { %1083 = vrot.lane.b32.xlu1 %v2849_v6, %s3016_s2 }
 0xb1b   :  { %v985_v7 = vpop.permute.xlu0 %984 }
 0xb1c   :  { %v987_v8 = vmul.f32 %v985_v7, %v970_v34 }
 0xb1e   :  { %1088 = vrot.lane.b32.xlu0 %v987_v8, %s3017_s9 }
 0xb23   :  { %v1084_v9 = vpop.permute.xlu1 %1083 }
 0xb24   :  { %v1086_v11 = vmul.f32 %v1084_v9, %v1069_v58 }
 0xb26   :  { %1093 = vrot.lane.b32.xlu1 %v1086_v11, %s3017_s9  ;;  %v205_v11 = vadd.f32 %v3316_v26, %v3234_v52 }
 0xb90   :  { %v1089_v12 = vpop.permute.xlu0 %1088 }
 0xb91   :  { %1091 = vst.msk [vmem:[#allocation4 + $0x18] sm:$0xff] %vm99_vm0, %v1089_v12  ;;  %2516 = vmatmul.mubr.msk.f32.vlgmr.msra.gmra.mrb[12].mxu0 %vm99_vm0, %v1089_v12 }
 0xb92   :  { %2705 = vmatpush3.bf16.msra.mxu0 %v3151_v16  ;;  %2537 = vmatprep.mubr.msk.f32.mxu0 %vm3015_vm1, %v3013_v0 }
 0xb93   :  { %2706 = vmatprep.subr.bf16.mxu0 %v3014_v18 }
 0xb96   :  { %2708 = vmatpush3.bf16.msra.mxu0 %v3171_v22 }
 0xb97   :  { %2715 = vmatprep.subr.bf16.mxu0 %v3014_v18 }
 0xb98   :  { %v1094_v14 = vpop.permute.xlu1 %1093 }
 0xb99   :  { %1096 = vst.msk [vmem:[#allocation5 + $0x20] sm:$0xff] %vm99_vm0, %v1094_v14  ;;  %2527 = vmatmul.mubr.msk.f32.vlgmr.msra.gmra.mrb[20].mxu1 %vm99_vm0, %v1094_v14 }
 0xb9a   :  { %2711 = vmatpush3.bf16.msra.mxu1 %v3194_v27  ;;  %2548 = vmatprep.mubr.msk.f32.mxu1 %vm3015_vm1, %v3013_v0 }
 0xb9b   :  { %2712 = vmatprep.subr.bf16.mxu1 %v3014_v18 }
 0xb9e   :  { %2714 = vmatpush3.bf16.msra.mxu1 %v3198_v30 }
 0xb9f   :  { %2721 = vmatprep.subr.bf16.mxu1 %v3014_v18 }
 0xc64   :  { %v1166_v15 = vpop.f32.mrb[12].mxu0 }
 0xc65   :  { %v1170_v10 = vadd.f32 %v1166_v15, %v215_v17  ;;  %v2517_v19 = vpop.f32.mrb[13].mxu0 }
 0xc67   :  { %v1172_v20 = vsub.f32 0.0, %v1170_v10 }
 0xc69   :  { %v1173_v13 = vmul.f32 1.442695, %v1172_v20 }
 0xc6b   :  { %2850 = vpow2.f32 %v1173_v13 }
 0xc6c   :  { %v1265_v23 = vpop.f32.mrb[20].mxu1 }
 0xc6d   :  { %v1269_v24 = vadd.f32 %v1265_v23, %v211_v21  ;;  %v2528_v25 = vpop.f32.mrb[21].mxu1 }
 0xc6f   :  { %v1271_v31 = vsub.f32 0.0, %v1269_v24 }
 0xc71   :  { %v1272_v33 = vmul.f32 1.442695, %v1271_v31 }
 0xc73   :  { %2852 = vpow2.f32 %v1272_v33 }
 0xc74   :  { %2854 = vtanh.f32 %v1170_v10 }
 0xc75   :  { %v2851_v36 = vpop.eup %2850 }
 0xc76   :  { %v1175_v40 = vadd.f32 1.0, %v2851_v36 }
 0xc78   :  { %2856 = vrcp.f32 %v1175_v40 }
 0xc79   :  { %2858 = vtanh.f32 %v1269_v24 }
 0xc7d   :  { %v2853_v32 = vpop.eup %2852 }
 0xc7e   :  { %v1274_v45 = vadd.f32 1.0, %v2853_v32  ;;  %v2855_v46 = vpop.eup %2854 }
 0xc80   :  { %2860 = vrcp.f32 %v1274_v45 }
 0xc82   :  { %v2857_v47 = vpop.eup %2856 }
 0xc83   :  { %v1178_v29 = vsel %vm3237_vm4, %v2855_v46, %v2857_v47  ;;  %v2859_v48 = vpop.eup %2858 }
 0xc84   :  { %1181 = vrot.lane.b32.xlu0 %v1178_v29, %s3016_s2  ;;  %v1179_v55 = vmul.f32 %v1178_v29, %v3390_v63 }
 0xc8a   :  { %v2861_v49 = vpop.eup %2860 }
 0xc8b   :  { %v1277_v50 = vsel %vm3237_vm4, %v2859_v48, %v2861_v49 }
 0xc8c   :  { %1280 = vrot.lane.b32.xlu1 %v1277_v50, %s3016_s2  ;;  %v1278_v57 = vmul.f32 %v1277_v50, %v3394_v4  ;;  %v221_v4 = vadd.f32 %v3218_v37, %v3229_v43 }
 0xcf6   :  { %v1182_v51 = vpop.permute.xlu0 %1181 }
 0xcf7   :  { %v1184_v28 = vmul.f32 %v1182_v51, %v1178_v29 }
 0xcf9   :  { %1186 = vrot.lane.b32.xlu0 %v1184_v28, %s3017_s9 }
 0xcfe   :  { %v1281_v53 = vpop.permute.xlu1 %1280 }
 0xcff   :  { %v1283_v54 = vmul.f32 %v1281_v53, %v1277_v50 }
 0xd01   :  { %1285 = vrot.lane.b32.xlu1 %v1283_v54, %s3017_s9 }
 0xd6b   :  { %v1187_v34 = vpop.permute.xlu0 %1186 }
 0xd6c   :  { %v3430_v56 = vadd.f32 %v1187_v34, %v1179_v55 }
 0xd6e   :  { %2862 = vtanh.f32 %v3430_v56 }
 0xd73   :  { %v1286_v58 = vpop.permute.xlu1 %1285 }
 0xd74   :  { %v3434_v59 = vadd.f32 %v1286_v58, %v1278_v57 }
 0xd76   :  { %2864 = vtanh.f32 %v3434_v59 }
 0xd78   :  { %v2863_v60 = vpop.eup %2862 }
 0xd79   :  { %1192 = vrot.lane.b32.xlu0 %v2863_v60, %s3016_s2 }
 0xd80   :  { %v2865_v61 = vpop.eup %2864 }
 0xd81   :  { %1291 = vrot.lane.b32.xlu1 %v2865_v61, %s3016_s2  ;;  %v199_v61 = vadd.f32 %v3280_v39, %v3234_v52 }
 0xdeb   :  { %v1193_v38 = vpop.permute.xlu0 %1192 }
 0xdec   :  { %v1195_v62 = vmul.f32 %v1193_v38, %v1178_v29 }
 0xdee   :  { %1296 = vrot.lane.b32.xlu0 %v1195_v62, %s3017_s9 }
 0xdf3   :  { %v1292_v42 = vpop.permute.xlu1 %1291 }
 0xdf4   :  { %v1294_v63 = vmul.f32 %v1292_v42, %v1277_v50 }
 0xdf6   :  { %1301 = vrot.lane.b32.xlu1 %v1294_v63, %s3017_s9 }
 0xe60   :  { %v1297_v1 = vpop.permute.xlu0 %1296 }
 0xe61   :  { %1299 = vst.msk [vmem:[#allocation4 + $0x20] sm:$0xff] %vm99_vm0, %v1297_v1  ;;  %2538 = vmatmul.mubr.msk.f32.vlgmr.msra.gmra.mrb[14].mxu0 %vm99_vm0, %v1297_v1 }
 0xe62   :  { %2717 = vmatpush3.bf16.msra.mxu0 %v3151_v16  ;;  %2559 = vmatprep.mubr.msk.f32.mxu0 %vm3015_vm1, %v3013_v0 }
 0xe63   :  { %2718 = vmatprep.subr.bf16.mxu0 %v3014_v18 }
 0xe66   :  { %2720 = vmatpush3.bf16.msra.mxu0 %v3171_v22 }
 0xe67   :  { %2727 = vmatprep.subr.bf16.mxu0 %v3014_v18 }
 0xe68   :  { %v1302_v3 = vpop.permute.xlu1 %1301 }
 0xe69   :  { %1304 = vst.msk [vmem:[#allocation5 + $0x18] sm:$0xff] %vm99_vm0, %v1302_v3  ;;  %2549 = vmatmul.mubr.msk.f32.vlgmr.msra.gmra.mrb[22].mxu1 %vm99_vm0, %v1302_v3 }
 0xe6a   :  { %2723 = vmatpush3.bf16.msra.mxu1 %v3194_v27  ;;  %2570 = vmatprep.mubr.msk.f32.mxu1 %vm3015_vm1, %v3013_v0 }
 0xe6b   :  { %2724 = vmatprep.subr.bf16.mxu1 %v3014_v18 }
 0xe6e   :  { %2726 = vmatpush3.bf16.msra.mxu1 %v3198_v30 }
 0xe6f   :  { %2733 = vmatprep.subr.bf16.mxu1 %v3014_v18 }
 0xf34   :  { %v1374_v5 = vpop.f32.mrb[14].mxu0 }
 0xf35   :  { %v1378_v6 = vadd.f32 %v1374_v5, %v221_v4  ;;  %v2539_v7 = vpop.f32.mrb[15].mxu0 }
 0xf37   :  { %v1380_v8 = vsub.f32 0.0, %v1378_v6 }
 0xf39   :  { %v1381_v9 = vmul.f32 1.442695, %v1380_v8 }
 0xf3b   :  { %2866 = vpow2.f32 %v1381_v9 }
 0xf3c   :  { %v1473_v12 = vpop.f32.mrb[22].mxu1 }
 0xf3d   :  { %v1477_v14 = vadd.f32 %v1473_v12, %v205_v11  ;;  %v2550_v17 = vpop.f32.mrb[23].mxu1 }
 0xf3f   :  { %v1479_v15 = vsub.f32 0.0, %v1477_v14 }
 0xf41   :  { %v1480_v10 = vmul.f32 1.442695, %v1479_v15 }
 0xf43   :  { %2868 = vpow2.f32 %v1480_v10 }
 0xf44   :  { %2870 = vtanh.f32 %v1378_v6 }
 0xf45   :  { %v2867_v19 = vpop.eup %2866 }
 0xf46   :  { %v1383_v20 = vadd.f32 1.0, %v2867_v19 }
 0xf48   :  { %2872 = vrcp.f32 %v1383_v20  ;;  %v1946_v20 = vld [vmem:[#allocation9] sm:$0xff] }
 0xf49   :  { %2874 = vtanh.f32 %v1477_v14 }
 0xf4d   :  { %v2869_v37 = vpop.eup %2868 }
 0xf4e   :  { %v1482_v13 = vadd.f32 1.0, %v2869_v37  ;;  %v2871_v21 = vpop.eup %2870  ;;  %v1947_v37 = vld [vmem:[#allocation9 + $0x8] sm:$0xff] }
 0xf50   :  { %2876 = vrcp.f32 %v1482_v13  ;;  %v2739_v13 = vpack.c.bf16 %v1947_v37, %v1946_v20  ;;  %v2109_v20 = vld [vmem:[#allocation11] sm:$0xff]  ;;  %v2110_v37 = vld [vmem:[#allocation11 + $0x8] sm:$0xff] }
 0xf52   :  { %v2873_v23 = vpop.eup %2872 }
 0xf53   :  { %v1386_v26 = vsel %vm3237_vm4, %v2871_v21, %v2873_v23  ;;  %v2875_v24 = vpop.eup %2874 }
 0xf54   :  { %1389 = vrot.lane.b32.xlu0 %v1386_v26, %s3016_s2  ;;  %v1387_v45 = vmul.f32 %v1386_v26, %v3430_v56 }
 0xf5a   :  { %v2877_v25 = vpop.eup %2876 }
 0xf5b   :  { %v1485_v31 = vsel %vm3237_vm4, %v2875_v24, %v2877_v25 }
 0xf5c   :  { %1488 = vrot.lane.b32.xlu1 %v1485_v31, %s3016_s2  ;;  %v1486_v29 = vmul.f32 %v1485_v31, %v3434_v59 }
 0xfc6   :  { %v1390_v33 = vpop.permute.xlu0 %1389 }
 0xfc7   :  { %v1392_v36 = vmul.f32 %v1390_v33, %v1386_v26  ;;  %v1948_v33 = vld [vmem:[#allocation9 + $0x10] sm:$0xff] }
 0xfc9   :  { %1394 = vrot.lane.b32.xlu0 %v1392_v36, %s3017_s9  ;;  %v1949_v36 = vld [vmem:[#allocation9 + $0x18] sm:$0xff] }
 0xfce   :  { %v1489_v40 = vpop.permute.xlu1 %1488 }
 0xfcf   :  { %v1491_v32 = vmul.f32 %v1489_v40, %v1485_v31  ;;  %v1930_v40 = vld [vmem:[#allocation4] sm:$0xff] }
 0xfd1   :  { %1493 = vrot.lane.b32.xlu1 %v1491_v32, %s3017_s9  ;;  %v2743_v32 = vpack.c.bf16 %v1949_v36, %v1948_v33 }
0x103b   :  { %v1395_v46 = vpop.permute.xlu0 %1394 }
0x103c   :  { %v3470_v47 = vadd.f32 %v1395_v46, %v1387_v45  ;;  %v1938_v46 = vmax.f32 %v1930_v40, 0.0 }
0x103e   :  { %2878 = vtanh.f32 %v3470_v47 }
0x1043   :  { %v1494_v48 = vpop.permute.xlu1 %1493 }
0x1044   :  { %v3474_v49 = vadd.f32 %v1494_v48, %v1486_v29  ;;  %v1932_v29 = vld [vmem:[#allocation4 + $0x10] sm:$0xff] }
0x1046   :  { %2880 = vtanh.f32 %v3474_v49 }
0x1048   :  { %v2879_v50 = vpop.eup %2878 }
0x1049   :  { %1400 = vrot.lane.b32.xlu0 %v2879_v50, %s3016_s2  ;;  %v1940_v50 = vmax.f32 %v1932_v29, 0.0 }
0x1050   :  { %v2881_v51 = vpop.eup %2880 }
0x1051   :  { %1499 = vrot.lane.b32.xlu1 %v2881_v51, %s3016_s2  ;;  %v1933_v51 = vld [vmem:[#allocation4 + $0x18] sm:$0xff] }
0x10bb   :  { %v1401_v28 = vpop.permute.xlu0 %1400 }
0x10bc   :  { %v1403_v53 = vmul.f32 %v1401_v28, %v1386_v26  ;;  %v1934_v28 = vld [vmem:[#allocation4 + $0x20] sm:$0xff] }
0x10be   :  { %1504 = vrot.lane.b32.xlu0 %v1403_v53, %s3017_s9  ;;  %v1941_v53 = vmax.f32 %v1933_v51, 0.0 }
0x10c3   :  { %v1500_v54 = vpop.permute.xlu1 %1499 }
0x10c4   :  { %v1502_v55 = vmul.f32 %v1500_v54, %v1485_v31  ;;  %v1942_v54 = vmax.f32 %v1934_v28, 0.0 }
0x10c6   :  { %1509 = vrot.lane.b32.xlu1 %v1502_v55, %s3017_s9 }
0x1130   :  { %v1505_v34 = vpop.permute.xlu0 %1504 }
0x1131   :  { %1507 = vst.msk [vmem:[#allocation4 + $0x28] sm:$0xff] %vm99_vm0, %v1505_v34  ;;  %2560 = vmatmul.mubr.msk.f32.vlgmr.msra.gmra.mrb[16].mxu0 %vm99_vm0, %v1505_v34 }
0x1132   :  { %2729 = vmatpush3.bf16.msra.mxu0 %v3151_v16  ;;  %2581 = vmatprep.mubr.msk.f32.mxu0 %vm3015_vm1, %v3013_v0  ;;  %v227_v16 = vadd.f32 %v3225_v41, %v3229_v43 }
0x1133   :  { %2730 = vmatprep.subr.bf16.mxu0 %v3014_v18 }
0x1136   :  { %2732 = vmatpush3.bf16.msra.mxu0 %v3171_v22 }
0x1137   :  { %2740 = vmatprep.subr.bf16.mxu0 %v2739_v13 }
0x1138   :  { %v1510_v56 = vpop.permute.xlu1 %1509  ;;  %v1935_v55 = vld [vmem:[#allocation4 + $0x28] sm:$0xff] }
0x1139   :  { %1512 = vst.msk [vmem:[#allocation5 + $0x10] sm:$0xff] %vm99_vm0, %v1510_v56  ;;  %2571 = vmatmul.mubr.msk.f32.vlgmr.msra.gmra.mrb[24].mxu1 %vm99_vm0, %v1510_v56  ;;  %v1943_v56 = vmax.f32 %v1935_v55, 0.0 }
0x113a   :  { %2735 = vmatpush3.bf16.msra.mxu1 %v3194_v27  ;;  %2592 = vmatprep.mubr.msk.f32.mxu1 %vm3015_vm1, %v3013_v0 }
0x113b   :  { %2736 = vmatprep.subr.bf16.mxu1 %v3014_v18 }
0x113e   :  { %2738 = vmatpush3.bf16.msra.mxu1 %v3198_v30 }
0x1204   :  { %v1582_v57 = vpop.f32.mrb[16].mxu0 }
0x1205   :  { %v1586_v58 = vadd.f32 %v1582_v57, %v227_v16  ;;  %v2561_v22 = vpop.f32.mrb[17].mxu0  ;;  %v233_v57 = vadd.f32 %v3231_v44, %v3229_v43 }
0x1207   :  { %v1588_v59 = vsub.f32 0.0, %v1586_v58 }
0x1209   :  { %v1589_v60 = vmul.f32 1.442695, %v1588_v59 }
0x120b   :  { %2882 = vpow2.f32 %v1589_v60 }
0x120c   :  { %v1681_v27 = vpop.f32.mrb[24].mxu1 }
0x120d   :  { %v1685_v38 = vadd.f32 %v1681_v27, %v199_v61  ;;  %v2572_v62 = vpop.f32.mrb[25].mxu1  ;;  %v193_v27 = vadd.f32 %v3216_v35, %v3234_v52 }
0x120f   :  { %v1687_v0 = vsub.f32 0.0, %v1685_v38 }
0x1211   :  { %v1688_v42 = vmul.f32 1.442695, %v1687_v0 }
0x1213   :  { %2884 = vpow2.f32 %v1688_v42 }
0x1214   :  { %2886 = vtanh.f32 %v1586_v58 }
0x1215   :  { %v2883_v18 = vpop.eup %2882 }
0x1216   :  { %v1591_v30 = vadd.f32 1.0, %v2883_v18 }
0x1218   :  { %2888 = vrcp.f32 %v1591_v30 }
0x1219   :  { %2890 = vtanh.f32 %v1685_v38 }
0x121d   :  { %v2885_v41 = vpop.eup %2884 }
0x121e   :  { %v1690_v63 = vadd.f32 1.0, %v2885_v41  ;;  %v2887_v1 = vpop.eup %2886 }
0x1220   :  { %2892 = vrcp.f32 %v1690_v63 }
0x1222   :  { %v2889_v3 = vpop.eup %2888 }
0x1223   :  { %v1594_v39 = vsel %vm3237_vm4, %v2887_v1, %v2889_v3  ;;  %v2891_v4 = vpop.eup %2890 }
0x1224   :  { %1597 = vrot.lane.b32.xlu0 %v1594_v39, %s3016_s2  ;;  %v1595_v12 = vmul.f32 %v1594_v39, %v3470_v47  ;;  %v1931_v47 = vld [vmem:[#allocation4 + $0x8] sm:$0xff] }
0x1225   :  { %v1939_v48 = vmax.f32 %v1931_v47, 0.0 }
0x122a   :  { %v2893_v5 = vpop.eup %2892 }
0x122b   :  { %v1693_v6 = vsel %vm3237_vm4, %v2891_v4, %v2893_v5 }
0x122c   :  { %1696 = vrot.lane.b32.xlu1 %v1693_v6, %s3016_s2  ;;  %v1694_v15 = vmul.f32 %v1693_v6, %v3474_v49 }
0x1296   :  { %v1598_v7 = vpop.permute.xlu0 %1597 }
0x1297   :  { %v1600_v8 = vmul.f32 %v1598_v7, %v1594_v39 }
0x1299   :  { %1602 = vrot.lane.b32.xlu0 %v1600_v8, %s3017_s9 }
0x129e   :  { %v1697_v9 = vpop.permute.xlu1 %1696 }
0x129f   :  { %v1699_v11 = vmul.f32 %v1697_v9, %v1693_v6 }
0x12a1   :  { %1701 = vrot.lane.b32.xlu1 %v1699_v11, %s3017_s9 }
0x130b   :  { %v1603_v14 = vpop.permute.xlu0 %1602 }
0x130c   :  { %v3508_v17 = vadd.f32 %v1603_v14, %v1595_v12 }
0x130e   :  { %2894 = vtanh.f32 %v3508_v17 }
0x1313   :  { %v1702_v10 = vpop.permute.xlu1 %1701 }
0x1314   :  { %v3512_v19 = vadd.f32 %v1702_v10, %v1694_v15 }
0x1316   :  { %2896 = vtanh.f32 %v3512_v19 }
0x1318   :  { %v2895_v21 = vpop.eup %2894 }
0x1319   :  { %1608 = vrot.lane.b32.xlu0 %v2895_v21, %s3016_s2  ;;  %v2111_v21 = vld [vmem:[#allocation11 + $0x10] sm:$0xff] }
0x1320   :  { %v2897_v23 = vpop.eup %2896 }
0x1321   :  { %1707 = vrot.lane.b32.xlu1 %v2897_v23, %s3016_s2  ;;  %v2112_v23 = vld [vmem:[#allocation11 + $0x18] sm:$0xff] }
0x138b   :  { %v1609_v26 = vpop.permute.xlu0 %1608 }
0x138c   :  { %v1611_v24 = vmul.f32 %v1609_v26, %v1594_v39 }
0x138e   :  { %1712 = vrot.lane.b32.xlu0 %v1611_v24, %s3017_s9  ;;  %v2751_v24 = vpack.c.bf16 %v2112_v23, %v2111_v21 }
0x1393   :  { %v1708_v25 = vpop.permute.xlu1 %1707 }
0x1394   :  { %v1710_v31 = vmul.f32 %v1708_v25, %v1693_v6 }
0x1396   :  { %1717 = vrot.lane.b32.xlu1 %v1710_v31, %s3017_s9 }
0x1400   :  { %v1713_v45 = vpop.permute.xlu0 %1712 }
0x1401   :  { %1715 = vst.msk [vmem:[#allocation4 + $0x30] sm:$0xff] %vm99_vm0, %v1713_v45  ;;  %2582 = vmatmul.mubr.msk.f32.vlgmr.msra.gmra.mrb[18].mxu0 %vm99_vm0, %v1713_v45 }
0x1402   :  { %2742 = vmatpush3.bf16.msra.mxu0 %v2739_v13  ;;  %2603 = vmatprep.mubr.msk.f32.mxu0 %vm99_vm0, %v1938_v46  ;;  %v2747_v13 = vpack.c.bf16 %v2110_v37, %v2109_v20  ;;  %v2095_v46 = vld [vmem:[#allocation5 + $0x10] sm:$0xff] }
0x1403   :  { %2744 = vmatprep.subr.bf16.mxu0 %v2743_v32 }
0x1406   :  { %2746 = vmatpush3.bf16.msra.mxu0 %v2743_v32 }
0x1407   :  { %2748 = vmatprep.subr.bf16.mxu0 %v2747_v13 }
0x1408   :  { %v1718_v49 = vpop.permute.xlu1 %1717  ;;  %v1936_v34 = vld [vmem:[#allocation4 + $0x30] sm:$0xff] }
0x1409   :  { %1720 = vst.msk [vmem:[#allocation5 + $0x8] sm:$0xff] %vm99_vm0, %v1718_v49  ;;  %2593 = vmatmul.mubr.msk.f32.vlgmr.msra.gmra.mrb[26].mxu1 %vm99_vm0, %v1718_v49  ;;  %2604 = vmatmul.mubr.msk.f32.vlgmr.msra.gmra.mrb[20].mxu0 %vm99_vm0, %v1939_v48  ;;  %v1944_v16 = vmax.f32 %v1936_v34, 0.0  ;;  %v2103_v48 = vmax.f32 %v2095_v46, 0.0  ;;  %v2096_v49 = vld [vmem:[#allocation5 + $0x18] sm:$0xff] }
0x140a   :  { %2606 = vmatprep.mubr.msk.f32.mxu0 %vm99_vm0, %v1940_v50  ;;  %2750 = vmatpush3.bf16.msra.mxu0 %v2747_v13  ;;  %v2097_v50 = vld [vmem:[#allocation5 + $0x20] sm:$0xff]  ;;  %v2104_v51 = vmax.f32 %v2096_v49, 0.0 }
0x140b   :  { %2752 = vmatprep.subr.bf16.mxu0 %v2751_v24  ;;  %v2105_v28 = vmax.f32 %v2097_v50, 0.0 }
0x140d   :  { %2607 = vmatmul.mubr.msk.f32.gmra.mrb[22].mxu0 %vm99_vm0, %v1941_v53  ;;  %v2098_v53 = vld [vmem:[#allocation5 + $0x28] sm:$0xff] }
0x140e   :  { %2609 = vmatprep.mubr.msk.f32.mxu0 %vm99_vm0, %v1942_v54  ;;  %2754 = vmatpush3.bf16.msra.mxu0 %v2751_v24  ;;  %v2099_v54 = vld [vmem:[#allocation5 + $0x30] sm:$0xff]  ;;  %v2106_v55 = vmax.f32 %v2098_v53, 0.0 }
0x140f   :  { %v2107_v34 = vmax.f32 %v2099_v54, 0.0 }
0x1410   :  { %v2094_v32 = vld [vmem:[#allocation5 + $0x8] sm:$0xff] }
0x1411   :  { %2610 = vmatmul.mubr.msk.f32.gmra.mrb[24].mxu0 %vm99_vm0, %v1943_v56  ;;  %v2102_v29 = vmax.f32 %v2094_v32, 0.0  ;;  %v2100_v56 = vld [vmem:[#allocation5 + $0x38] sm:$0xff] }
0x1412   :  { %2612 = vmatprep.mubr.msk.f32.mxu0 %vm99_vm0, %v1944_v16  ;;  %v2108_v16 = vmax.f32 %v2100_v56, 0.0 }
0x14d4   :  { %v1790_v58 = vpop.f32.mrb[18].mxu0 }
0x14d5   :  { %v1794_v22 = vadd.f32 %v1790_v58, %v233_v57  ;;  %v2583_v59 = vpop.f32.mrb[19].mxu0  ;;  %v2306_v57 = vld [vmem:[%s3584_s7] ss:$0 sm:$0xff]  ;;  %s2980_s7 = scalar_lea.vmem %s2264_s20, 1024 }
0x14d6   :  { %p2981_p10 = scmp.ne.s32.totalorder %s2264_s20, %s2980_s7  ;;  %p2986_p12 = scmp.lt.s32.totalorder %s2980_s7, %s2980_s7 }
0x14d7   :  { %v1796_v60 = vsub.f32 0.0, %v1794_v22 }
0x14d8   :  { %p2987_p13 = por %p2986_p12, %p2985_p11 }
0x14d9   :  { %v1797_v61 = vmul.f32 1.442695, %v1796_v60 }
0x14da   :  { %p2988_p0 = pnand %p2987_p13, %p2981_p10 }
0x14db   :  { %2898 = vpow2.f32 %v1797_v61 }
0x14dc   :  { %v1889_v38 = vpop.f32.mrb[26].mxu1 }
0x14dd   :  { %v1893_v62 = vadd.f32 %v1889_v38, %v193_v27  ;;  %v2594_v0 = vpop.f32.mrb[27].mxu1 }
0x14df   :  { %v1895_v42 = vsub.f32 0.0, %v1893_v62 }
0x14e1   :  { %v1896_v18 = vmul.f32 1.442695, %v1895_v42 }
0x14e3   :  { %2900 = vpow2.f32 %v1896_v18 }
0x14e4   :  { %2902 = vtanh.f32 %v1794_v22 }
0x14e5   :  { %v2899_v30 = vpop.eup %2898 }
0x14e6   :  { %v1799_v41 = vadd.f32 1.0, %v2899_v30 }
0x14e8   :  { %2904 = vrcp.f32 %v1799_v41 }
0x14e9   :  { %2906 = vtanh.f32 %v1893_v62 }
0x14ed   :  { %v2901_v43 = vpop.eup %2900 }
0x14ee   :  { %v1898_v44 = vadd.f32 1.0, %v2901_v43  ;;  %v2903_v63 = vpop.eup %2902 }
0x14f0   :  { %2908 = vrcp.f32 %v1898_v44 }
0x14f2   :  { %v2905_v1 = vpop.eup %2904 }
0x14f3   :  { %v1802_v35 = vsel %vm3237_vm4, %v2903_v63, %v2905_v1  ;;  %v2907_v52 = vpop.eup %2906 }
0x14f4   :  { %1805 = vrot.lane.b32.xlu0 %v1802_v35, %s3016_s2  ;;  %v1803_v8 = vmul.f32 %v1802_v35, %v3508_v17 }
0x14fa   :  { %v2909_v3 = vpop.eup %2908 }
0x14fb   :  { %v1901_v39 = vsel %vm3237_vm4, %v2907_v52, %v2909_v3 }
0x14fc   :  { %1904 = vrot.lane.b32.xlu1 %v1901_v39, %s3016_s2  ;;  %v1902_v12 = vmul.f32 %v1901_v39, %v3512_v19 }
0x1566   :  { %v1806_v4 = vpop.permute.xlu0 %1805 }
0x1567   :  { %v1808_v5 = vmul.f32 %v1806_v4, %v1802_v35 }
0x1569   :  { %1810 = vrot.lane.b32.xlu0 %v1808_v5, %s3017_s9 }
0x156e   :  { %v1905_v6 = vpop.permute.xlu1 %1904 }
0x156f   :  { %v1907_v7 = vmul.f32 %v1905_v6, %v1901_v39 }
0x1571   :  { %1909 = vrot.lane.b32.xlu1 %v1907_v7, %s3017_s9 }
0x15db   :  { %v1811_v9 = vpop.permute.xlu0 %1810 }
0x15dc   :  { %v1813_v11 = vadd.f32 %v1811_v9, %v1803_v8 }
0x15de   :  { %2910 = vtanh.f32 %v1813_v11 }
0x15e3   :  { %v1910_v14 = vpop.permute.xlu1 %1909 }
0x15e4   :  { %v1912_v2 = vadd.f32 %v1910_v14, %v1902_v12 }
0x15e6   :  { %2912 = vtanh.f32 %v1912_v2 }
0x15e8   :  { %v2911_v15 = vpop.eup %2910 }
0x15e9   :  { %1816 = vrot.lane.b32.xlu0 %v2911_v15, %s3016_s2 }
0x15f0   :  { %v2913_v10 = vpop.eup %2912 }
0x15f1   :  { %1915 = vrot.lane.b32.xlu1 %v2913_v10, %s3016_s2 }
0x165b   :  { %v1817_v17 = vpop.permute.xlu0 %1816 }
0x165c   :  { %v1819_v26 = vmul.f32 %v1817_v17, %v1802_v35 }
0x165e   :  { %1920 = vrot.lane.b32.xlu0 %v1819_v26, %s3017_s9 }
0x1663   :  { %v1916_v19 = vpop.permute.xlu1 %1915 }
0x1664   :  { %v1918_v25 = vmul.f32 %v1916_v19, %v1901_v39 }
0x1666   :  { %1925 = vrot.lane.b32.xlu1 %v1918_v25, %s3017_s9 }
0x16d0   :  { %v1921_v31 = vpop.permute.xlu0 %1920 }
0x16d1   :  { %1923 = vst.msk [vmem:[#allocation4 + $0x38] sm:$0xff] %vm99_vm0, %v1921_v31 }
0x16d8   :  { %v1926_v33 = vpop.permute.xlu1 %1925  ;;  %v1937_v36 = vld [vmem:[#allocation4 + $0x38] sm:$0xff] }
0x16d9   :  { %1928 = vst.msk [vmem:[#allocation5] sm:$0xff] %vm99_vm0, %v1926_v33  ;;  %v1945_v40 = vmax.f32 %v1937_v36, 0.0 }
0x16db   :  { %2613 = vmatmul.mubr.msk.f32.gmra.mrb[26].mxu0 %vm99_vm0, %v1945_v40 }
0x16e0   :  { %v2093_v45 = vld [vmem:[#allocation5] sm:$0xff] }
0x16e1   :  { %v2101_v47 = vmax.f32 %v2093_v45, 0.0 }
0x16e3   :  { %2623 = vmatprep.mubr.msk.f32.mxu0 %vm99_vm0, %v2101_v47 }
0x16e4   :  { %2624 = vmatmul.mubr.msk.f32.vlgmr.msra.gmra.mrb[20].mxu0 %vm99_vm0, %v2102_v29 }
0x16e5   :  { %2626 = vmatprep.mubr.msk.f32.mxu0 %vm99_vm0, %v2103_v48 }
0x16e8   :  { %2627 = vmatmul.mubr.msk.f32.gmra.mrb[22].mxu0 %vm99_vm0, %v2104_v51 }
0x16e9   :  { %2629 = vmatprep.mubr.msk.f32.mxu0 %vm99_vm0, %v2105_v28 }
0x16ec   :  { %2630 = vmatmul.mubr.msk.f32.gmra.mrb[24].mxu0 %vm99_vm0, %v2106_v55 }
0x16ed   :  { %2632 = vmatprep.mubr.msk.f32.mxu0 %vm99_vm0, %v2107_v34 }
0x16f0   :  { %2633 = vmatmul.mubr.msk.f32.gmra.mrb[26].mxu0 %vm99_vm0, %v2108_v16 }
0x17b7   :  { %v2625_v58 = vpop.f32.mrb[20].mxu0 }
0x17b8   :  { %v2759_v22 = vadd.f32 %v2625_v58, %v2306_v57  ;;  %v2203_v59 = vpop.f32.mrb[21].mxu0 }
0x17b9   :  { %v2760_v60 = vadd.f32 %v2306_v57, %v2203_v59 }
0x17ba   :  { %2251 = vst [vmem:[#allocation12 + $0x8] sm:$0xff] %v2759_v22 }
0x17bb   :  { %2250 = vst [vmem:[#allocation12] sm:$0xff] %v2760_v60  ;;  %v2628_v61 = vpop.f32.mrb[22].mxu0 }
0x17bc   :  { %v2761_v27 = vadd.f32 %v2628_v61, %v2306_v57  ;;  %v2213_v38 = vpop.f32.mrb[23].mxu0 }
0x17bd   :  { %v2762_v62 = vadd.f32 %v2306_v57, %v2213_v38 }
0x17be   :  { %2253 = vst [vmem:[#allocation12 + $0x18] sm:$0xff] %v2761_v27 }
0x17bf   :  { %2252 = vst [vmem:[#allocation12 + $0x10] sm:$0xff] %v2762_v62  ;;  %v2631_v0 = vpop.f32.mrb[24].mxu0 }
0x17c0   :  { %v2763_v42 = vadd.f32 %v2631_v0, %v2306_v57  ;;  %v2223_v18 = vpop.f32.mrb[25].mxu0 }
0x17c1   :  { %v2764_v30 = vadd.f32 %v2306_v57, %v2223_v18 }
0x17c2   :  { %2255 = vst [vmem:[#allocation12 + $0x28] sm:$0xff] %v2763_v42 }
0x17c3   :  { %2254 = vst [vmem:[#allocation12 + $0x20] sm:$0xff] %v2764_v30  ;;  %v2634_v41 = vpop.f32.mrb[26].mxu0 }
0x17c4   :  { %v2765_v43 = vadd.f32 %v2634_v41, %v2306_v57  ;;  %v2233_v44 = vpop.f32.mrb[27].mxu0 }
0x17c5   :  { %v2766_v63 = vadd.f32 %v2306_v57, %v2233_v44 }
0x17c6   :  { %2257 = vst [vmem:[#allocation12 + $0x38] sm:$0xff] %v2765_v43 }
0x17c7   :  { %2256 = vst [vmem:[#allocation12 + $0x30] sm:$0xff] %v2766_v63 }
0x17c8   :  { %2991 = shalt.err (!%p2988_p0)
}
0x17c9   :  { %s2992_s30 = scalar_lea.hbm %s3585_s8, 1024 }
0x17ca   :  { %p2993_p1 = scmp.ne.s32.totalorder %s3585_s8, %s2992_s30  ;;  %p2996_p2 = scmp.lt.u32.totalorder %s2992_s30, %s3585_s8 }
0x17cc   :  { %p2998_p3 = pnand %p2996_p2, %p2993_p1 }
0x17ce   :  { %3001 = shalt.err (!%p2998_p3)
}
0x17cf   :  { %2269 = dma.vmem_to_hbm [thread:$0]  %s2264_s20, 1024, %s3585_s8, [#allocation8], %s3010_s17, %s3010_s17, %s3011_s18  }
0x17d0   :  { %3006 = dma.done.wait [#allocation8], 1024  }
0x17d1   :  { %3007 = vsyncadd [#allocation8], 4294966272 }
0x17d2   :  { %2273 = vsyncpa [#allocation7], 1 }
0x17d3   :  { %2274 = vsyncpa [#allocation10], 1 }
0x17d4   :  { %2275 = vsyncpa [#allocation8], 1 }

</bundles_post_ra>
